<compile_context>
chip_gen: v7x
topology: tpu7x:2x2x1
jax: 0.10.0
libtpu: 0.0.40
codegen_flags: <defaults>
</compile_context>

<pallas_src>
import functools

import numpy as np
import jax
import jax.numpy as jnp
from jax.experimental import pallas as pl
from jax.experimental.pallas import tpu as pltpu


_BETA = 20.0          # photometric softmax-splat weight scale
_EPS = 1e-7
_VMEM_LIMIT = 32 * 1024 * 1024   # <= physical VMEM on v5e/v6e (128 MiB) and v7x (64 MiB)

_PAR1 = pltpu.CompilerParams(dimension_semantics=("parallel",),
                             vmem_limit_bytes=_VMEM_LIMIT)
_PAR2 = pltpu.CompilerParams(dimension_semantics=("parallel", "parallel"),
                             vmem_limit_bytes=_VMEM_LIMIT)


# --------------------------------------------------------------------------- #
# tiling helpers
# --------------------------------------------------------------------------- #
def _pick_spatial_tile(hw, bytes_per_pixel, budget_bytes=4 << 20):
    """Largest lane-aligned spatial tile such that the double-buffered in/out blocks
    of one grid step stay under `budget_bytes` (fits v5e's 16 MiB default scoped
    VMEM and leaves headroom on v7x's 64 MiB physical VMEM), while guaranteeing
    >= 2 spatial grid steps whenever hw allows it (keeps both v7x TCs busy at B=1)."""
    if hw % 256 != 0:
        return hw
    tile = hw
    if tile % 512 == 0:
        tile //= 2                      # at least 2 grid steps along the lane axis
    while tile % 512 == 0 and 2 * tile * bytes_per_pixel > budget_bytes:
        tile //= 2
    return tile


def _channel_group(c, spatial, budget_bytes=2 << 20):
    """Channel-group size for the resize kernel (must divide c, bounded by VMEM)."""
    cap = max(1, budget_bytes // max(1, spatial * 4))
    if c <= cap:
        return c
    for g in range(min(cap, c), 0, -1):
        if c % g == 0:
            return g
    return 1


# --------------------------------------------------------------------------- #
# Pallas kernels
# --------------------------------------------------------------------------- #
def _scale_flows_kernel(t_ref, f10_ref, f01_ref, o1t_ref, o0t_ref):
    # flow1tot = (1 - t) * flow1to0 ; flow0tot = t * flow0to1.  t lives in SMEM.
    t = t_ref[pl.program_id(0)]
    o1t_ref[...] = ((1.0 - t) * f10_ref[...]).astype(o1t_ref.dtype)
    o0t_ref[...] = (t * f01_ref[...]).astype(o0t_ref.dtype)


def _conv1x1_kernel(x_ref, w_ref, b_ref, o_ref, *, relu):
    # out = W @ x (+ b): bf16 MXU operands (weights pre-cast in the wrapper),
    # f32 accumulation, H*W stays on lanes.
    y = jnp.dot(w_ref[...], x_ref[0].astype(jnp.bfloat16),
                preferred_element_type=jnp.float32) + b_ref[...]
    if relu:
        y = jnp.maximum(y, 0.0)
    o_ref[0] = y.astype(o_ref.dtype)


def _resize_body(x, ah, awT, tall):
    # Separable bilinear resize of a (CG, H, W) block -> (CG, h, w) f32.
    cg, H, W = x.shape
    h = ah.shape[0]
    w = awT.shape[1]
    if tall:
        # Width pass as ONE tall MXU matmul (CG*H rows fill the M dimension).
        t = jnp.dot(x.reshape(cg * H, W).astype(jnp.bfloat16), awT,
                    preferred_element_type=jnp.float32).reshape(cg, H, w)
    else:
        awT_b = jnp.broadcast_to(awT, (cg, W, w))
        t = jax.lax.dot_general(x.astype(jnp.bfloat16), awT_b,
                                (((2,), (1,)), ((0,), (0,))),
                                preferred_element_type=jnp.float32)
    # Height pass: batched matmul.  The broadcast lhs is kept on purpose: a
    # (h,H)x(CG,H,w) dot_general with no batch dims is not reliably lowerable by
    # Mosaic, and ah is tiny relative to the blocks being resized.
    ah_b = jnp.broadcast_to(ah, (cg, h, H))
    return jax.lax.dot_general(ah_b, t.astype(jnp.bfloat16),
                               (((2,), (1,)), ((0,), (0,))),
                               preferred_element_type=jnp.float32)


def _resize_kernel(x_ref, ah_ref, awT_ref, o_ref, *, tall):
    o = _resize_body(x_ref[0], ah_ref[...], awT_ref[...], tall)
    o_ref[0] = o.astype(o_ref.dtype)


def _resize_scale_kernel(x_ref, ah_ref, awT_ref, s_ref, o_ref, *, tall):
    o = _resize_body(x_ref[0], ah_ref[...], awT_ref[...], tall)
    o_ref[0] = (o * s_ref[...][:, :, None]).astype(o_ref.dtype)


def _nedt_cat_kernel(x_ref, o_ref):
    # TODO(synk): NEDT class body not provided; stand-in = tanh of per-pixel
    # finite-difference gradient magnitude summed over channels (replicate boundary).
    # Output buffer already contains the concatenated [x, nedt(x)] channels.
    # TODO(synk): tile H/W with a 1-row halo for production resolutions (whole-image
    # block here can exceed v7x VMEM at large H*W).
    x = x_ref[0]                                          # (C, H, W) f32
    c, H, W = x.shape
    dx = jnp.abs(x - pltpu.roll(x, shift=1, axis=2))      # lanes (W)
    dy = jnp.abs(x - pltpu.roll(x, shift=1, axis=1))      # sublanes (H)
    col = jax.lax.broadcasted_iota(jnp.int32, (H, W), 1)
    row = jax.lax.broadcasted_iota(jnp.int32, (H, W), 0)
    g = jnp.sum(jnp.where(col > 0, dx, 0.0) + jnp.where(row > 0, dy, 0.0),
                axis=0, keepdims=True)                    # (1, H, W)
    o_ref[0, :c] = x.astype(o_ref.dtype)
    o_ref[0, c:] = jnp.tanh(g).astype(o_ref.dtype)


def _photo_premul_kernel(a_ref, b_ref, z_ref, numw_ref):
    # Fused: z = -beta * mean_c |a - b|; w = exp(z); numw = [a * w ; w]
    a = a_ref[0].astype(jnp.float32)                      # (C, TN)
    b = b_ref[0].astype(jnp.float32)
    c = a.shape[0]
    z = -_BETA * jnp.mean(jnp.abs(a - b), axis=0, keepdims=True)
    w = jnp.exp(z)
    z_ref[0] = z.astype(z_ref.dtype)
    numw_ref[0, :c] = (a * w).astype(numw_ref.dtype)
    numw_ref[0, c:] = w.astype(numw_ref.dtype)


def _premul_exp_kernel(x_ref, z_ref, numw_ref):
    # numw = [x * exp(z) ; exp(z)] packed into one tensor -> a single forward splat.
    c = x_ref.shape[1]
    w = jnp.exp(z_ref[0].astype(jnp.float32))
    numw_ref[0, :c] = (x_ref[0].astype(jnp.float32) * w).astype(numw_ref.dtype)
    numw_ref[0, c:] = w.astype(numw_ref.dtype)


def _normalize_kernel(numw_ref, o_ref):
    c = o_ref.shape[1]
    num = numw_ref[0, :c]
    inv = pl.reciprocal(numw_ref[0, c:] + _EPS, approx=True)   # EUP slot
    o_ref[0] = (num * inv).astype(o_ref.dtype)


# --------------------------------------------------------------------------- #
# Pallas wrappers
# --------------------------------------------------------------------------- #
def scale_flows(flow1to0, flow0to1, t_vec):
    B, C, H, W = flow1to0.shape
    HW = H * W
    bpp = 2 * C * 4 + 2 * C * 2              # two f32 inputs + two bf16 outputs
    TN = _pick_spatial_tile(HW, bpp)
    spec = pl.BlockSpec((1, C, TN), lambda b, n: (b, 0, n))
    sds = jax.ShapeDtypeStruct((B, C, HW), jnp.bfloat16)
    o1t, o0t = pl.pallas_call(
        _scale_flows_kernel,
        grid=(B, HW // TN),
        in_specs=[pl.BlockSpec(memory_space=pltpu.MemorySpace.SMEM), spec, spec],
        out_specs=(spec, spec),
        out_shape=(sds, sds),
        compiler_params=_PAR2,
    )(t_vec, flow1to0.reshape(B, C, HW), flow0to1.reshape(B, C, HW))
    return o1t.reshape(B, C, H, W), o0t.reshape(B, C, H, W)


def conv1x1(x, w, b, relu, out_dtype=jnp.bfloat16):
    """1x1 conv on NCHW input: per-batch (Cout,Cin)@(Cin,H*W), lane axis tiled."""
    B, Cin, H, W = x.shape
    Cout = w.shape[0]
    HW = H * W
    bpp = Cin * x.dtype.itemsize + Cout * jnp.dtype(out_dtype).itemsize
    TN = _pick_spatial_tile(HW, bpp)
    w = w.astype(jnp.bfloat16)            # one-time constant cast outside the kernel
    out = pl.pallas_call(
        functools.partial(_conv1x1_kernel, relu=relu),
        grid=(B, HW // TN),
        in_specs=[pl.BlockSpec((1, Cin, TN), lambda bb, n: (bb, 0, n)),
                  pl.BlockSpec((Cout, Cin), lambda bb, n: (0, 0)),
                  pl.BlockSpec((Cout, 1), lambda bb, n: (0, 0))],
        out_specs=pl.BlockSpec((1, Cout, TN), lambda bb, n: (bb, 0, n)),
        out_shape=jax.ShapeDtypeStruct((B, Cout, HW), out_dtype),
        compiler_params=_PAR2,
    )(x.reshape(B, Cin, HW), w, b)
    return out.reshape(B, Cout, H, W)


def _resize_matrix(n_out, n_in):
    i = np.arange(n_out, dtype=np.float64)
    src = (i + 0.5) * (n_in / n_out) - 0.5
    src = np.maximum(src, 0.0)
    x0 = np.minimum(np.floor(src).astype(np.int64), n_in - 1)
    x1 = np.minimum(x0 + 1, n_in - 1)
    w1 = src - x0
    w0 = 1.0 - w1
    M = np.zeros((n_out, n_in), dtype=np.float32)
    M[np.arange(n_out), x0] += w0
    M[np.arange(n_out), x1] += w1
    return M


def bilinear_resize(x, h_out, w_out, channel_scale=None):
    """interpolate(mode='bilinear', align_corners=False), channel-group batched.
    `channel_scale` (optional, shape (C,)) multiplies the output per channel."""
    B, C, H, W = x.shape
    if (h_out, w_out) == (H, W) and channel_scale is None:
        return x
    ah = jnp.asarray(_resize_matrix(h_out, H), jnp.bfloat16)        # (h, H)
    awT = jnp.asarray(_resize_matrix(w_out, W).T, jnp.bfloat16)     # (W, w)
    tall = (H % 8 == 0)       # layout-free reshape -> tall MXU matmul for width pass
    CG = C if channel_scale is not None else _channel_group(C, H * W)
    in_specs = [pl.BlockSpec((1, CG, H, W), lambda b, c: (b, c, 0, 0)),
                pl.BlockSpec((h_out, H), lambda b, c: (0, 0)),
                pl.BlockSpec((W, w_out), lambda b, c: (0, 0))]
    args = [x, ah, awT]
    if channel_scale is None:
        kern = functools.partial(_resize_kernel, tall=tall)
    else:
        kern = functools.partial(_resize_scale_kernel, tall=tall)
        in_specs.append(pl.BlockSpec((C, 1), lambda b, c: (0, 0)))
        args.append(jnp.asarray(channel_scale, jnp.float32).reshape(C, 1))
    return pl.pallas_call(
        kern,
        grid=(B, C // CG),
        in_specs=in_specs,
        out_specs=pl.BlockSpec((1, CG, h_out, w_out), lambda b, c: (b, c, 0, 0)),
        out_shape=jax.ShapeDtypeStruct((B, C, h_out, w_out), jnp.bfloat16),
        compiler_params=_PAR2,
    )(*args)


def nedt_cat(x):
    """Returns concat([x, NEDT(x)], dim=1) written by a single kernel (bf16)."""
    B, C, H, W = x.shape
    return pl.pallas_call(
        _nedt_cat_kernel,
        grid=(B,),
        in_specs=[pl.BlockSpec((1, C, H, W), lambda b: (b, 0, 0, 0))],
        out_specs=pl.BlockSpec((1, C + 1, H, W), lambda b: (b, 0, 0, 0)),
        out_shape=jax.ShapeDtypeStruct((B, C + 1, H, W), jnp.bfloat16),
        compiler_params=_PAR1,
    )(x)


def photo_premul(a, b):
    """Fused photometric z-metric + exp + premultiply.  Returns (z, numw) with
    numw[:, :C] = a * exp(z) and numw[:, C] = exp(z); both stored bf16."""
    B, C, H, W = a.shape
    HW = H * W
    bpp = C * a.dtype.itemsize + C * b.dtype.itemsize + (C + 2) * 2
    TN = _pick_spatial_tile(HW, bpp)
    xs = pl.BlockSpec((1, C, TN), lambda bb, n: (bb, 0, n))
    zs = pl.BlockSpec((1, 1, TN), lambda bb, n: (bb, 0, n))
    ns = pl.BlockSpec((1, C + 1, TN), lambda bb, n: (bb, 0, n))
    z, numw = pl.pallas_call(
        _photo_premul_kernel,
        grid=(B, HW // TN),
        in_specs=[xs, xs],
        out_specs=(zs, ns),
        out_shape=(jax.ShapeDtypeStruct((B, 1, HW), jnp.bfloat16),
                   jax.ShapeDtypeStruct((B, C + 1, HW), jnp.bfloat16)),
        compiler_params=_PAR2,
    )(a.reshape(B, C, HW), b.reshape(B, C, HW))
    return z.reshape(B, 1, H, W), numw.reshape(B, C + 1, H, W)


def premul_exp(x, z):
    """Packed splat source: numw = [x * exp(z) ; exp(z)] (C+1 channels, bf16)."""
    B, C, H, W = x.shape
    HW = H * W
    bpp = C * x.dtype.itemsize + z.dtype.itemsize + (C + 1) * 2
    TN = _pick_spatial_tile(HW, bpp)
    numw = pl.pallas_call(
        _premul_exp_kernel,
        grid=(B, HW // TN),
        in_specs=[pl.BlockSpec((1, C, TN), lambda bb, n: (bb, 0, n)),
                  pl.BlockSpec((1, 1, TN), lambda bb, n: (bb, 0, n))],
        out_specs=pl.BlockSpec((1, C + 1, TN), lambda bb, n: (bb, 0, n)),
        out_shape=jax.ShapeDtypeStruct((B, C + 1, HW), jnp.bfloat16),
        compiler_params=_PAR2,
    )(x.reshape(B, C, HW), z.reshape(B, 1, HW))
    return numw.reshape(B, C + 1, H, W)


def splat_normalize(numw):
    """numw = [splatted numerator (C ch) ; splatted weight (1 ch)] -> num/(w+eps)."""
    B, C1, H, W = numw.shape
    C = C1 - 1
    HW = H * W
    bpp = C1 * numw.dtype.itemsize + C * 2
    TN = _pick_spatial_tile(HW, bpp)
    out = pl.pallas_call(
        _normalize_kernel,
        grid=(B, HW // TN),
        in_specs=[pl.BlockSpec((1, C1, TN), lambda bb, n: (bb, 0, n))],
        out_specs=pl.BlockSpec((1, C, TN), lambda bb, n: (bb, 0, n)),
        out_shape=jax.ShapeDtypeStruct((B, C, HW), jnp.bfloat16),
        compiler_params=_PAR2,
    )(numw.reshape(B, C1, HW))
    return out.reshape(B, C, H, W)


# --------------------------------------------------------------------------- #
# Plain-JAX glue for data-dependent gather / scatter
# --------------------------------------------------------------------------- #
def _grid(H, W):
    return jnp.meshgrid(jnp.arange(H, dtype=jnp.float32),
                        jnp.arange(W, dtype=jnp.float32), indexing="ij")


def forward_splat(src, flow):
    # TODO(synk): data-dependent scatter-add (summation splatting) has no clean Pallas
    # TPU equivalent; kept in plain JAX.  Loops over the 4 bilinear corners (4 small
    # scatters) instead of materializing a (B,C,4,H,W) contrib tensor; accumulates f32.
    B, C, H, W = src.shape
    gy, gx = _grid(H, W)
    tx = gx[None] + flow[:, 0].astype(jnp.float32)
    ty = gy[None] + flow[:, 1].astype(jnp.float32)
    x0 = jnp.floor(tx)
    y0 = jnp.floor(ty)
    bidx = jnp.arange(B)[:, None, None]
    cidx = jnp.arange(C)[None, :, None]
    out = jnp.zeros((B, C, H * W), jnp.float32)
    for dy in (0.0, 1.0):
        for dx in (0.0, 1.0):
            xi, yi = x0 + dx, y0 + dy
            w = (1.0 - jnp.abs(tx - xi)) * (1.0 - jnp.abs(ty - yi))
            valid = (xi >= 0) & (xi <= W - 1) & (yi >= 0) & (yi <= H - 1)
            w = jnp.where(valid, w, 0.0)                               # (B,H,W) f32
            idx = (jnp.clip(yi, 0, H - 1).astype(jnp.int32) * W
                   + jnp.clip(xi, 0, W - 1).astype(jnp.int32)).reshape(B, 1, H * W)
            contrib = (src * w[:, None]).reshape(B, C, H * W)          # f32 (promoted)
            out = out.at[bidx, cidx, idx].add(contrib)
    return out.reshape(B, C, H, W)


def backward_warp(src, flow):
    # TODO(synk): bilinear gather (grid_sample); 4 corner gathers, f32 accumulation,
    # source stays bf16 for the gather.
    B, C, H, W = src.shape
    gy, gx = _grid(H, W)
    sx = gx[None] + flow[:, 0].astype(jnp.float32)
    sy = gy[None] + flow[:, 1].astype(jnp.float32)
    x0 = jnp.floor(sx)
    y0 = jnp.floor(sy)
    flat_src = src.reshape(B, C, H * W)
    bidx = jnp.arange(B)[:, None, None]
    cidx = jnp.arange(C)[None, :, None]
    acc = jnp.zeros((B, C, H, W), jnp.float32)
    for dy in (0.0, 1.0):
        for dx in (0.0, 1.0):
            xi, yi = x0 + dx, y0 + dy
            w = (1.0 - jnp.abs(sx - xi)) * (1.0 - jnp.abs(sy - yi))
            valid = (xi >= 0) & (xi <= W - 1) & (yi >= 0) & (yi <= H - 1)
            w = jnp.where(valid, w, 0.0)
            idx = (jnp.clip(yi, 0, H - 1).astype(jnp.int32) * W
                   + jnp.clip(xi, 0, W - 1).astype(jnp.int32)).reshape(B, 1, H * W)
            g = flat_src[bidx, cidx, idx].reshape(B, C, H, W)
            acc = acc + g * w[:, None]
    return acc.astype(src.dtype)


# --------------------------------------------------------------------------- #
# Module stand-ins mirroring the PyTorch structure
# --------------------------------------------------------------------------- #
class NEDT:
    def __call__(self, x):
        # returns cat([x, nedt(x)], dim=1) fused in a single kernel
        return nedt_cat(x)


class Extractor:
    # TODO(synk): original Extractor (3x3 strided conv blocks) not provided; stand-in =
    # bilinear /2 downsample + 1x1 conv + ReLU (both Pallas) per pyramid level.
    # TODO(synk): the per-level resize+conv could be fused into one kernel to skip an
    # HBM round trip of the downsampled activations; kept separate because the
    # in-kernel (C,h,w)->(C,h*w) lane-merging reshape is a Mosaic relayout risk.
    def __init__(self, key, channels):
        self.params = []
        for cin, cout in zip(channels[:-1], channels[1:]):
            key, sub = jax.random.split(key)
            w = (jax.random.normal(sub, (cout, cin), jnp.float32)
                 / np.sqrt(cin)).astype(jnp.bfloat16)
            b = jnp.zeros((cout, 1), jnp.float32)
            self.params.append((w, b))

    def __call__(self, x):
        feats, h = [], x
        for w, b in self.params:
            h = bilinear_resize(h, h.shape[2] // 2, h.shape[3] // 2)
            h = conv1x1(h, w, b, relu=True, out_dtype=jnp.bfloat16)
            feats.append(h)
        return feats


class HalfWarper:
    # TODO(synk): HalfWarper class body not provided; stand-in = softmax splatting with
    # a brightness-constancy z metric (data-dependent scatter kept in plain JAX).
    @staticmethod
    def z_metric_and_premul(I0, I1, flow1to0, flow0to1):
        z0to1, numw0 = photo_premul(I0, backward_warp(I1, flow0to1))
        z1to0, numw1 = photo_premul(I1, backward_warp(I0, flow1to0))
        return (z1to0, z0to1), (numw0, numw1)

    @staticmethod
    def _softmax_splat_packed(numw, flow):
        return splat_normalize(forward_splat(numw, flow))

    def splat_packed(self, numw0, numw1, flow1tot, flow0tot):
        base0 = self._softmax_splat_packed(numw0, flow0tot)
        base1 = self._softmax_splat_packed(numw1, flow1tot)
        return base0, base1

    def __call__(self, feat0, feat1, fz):
        # fz channels: [flow1tot(0:2), flow0tot(2:4), z1to0(4), z0to1(5)]
        numw0 = premul_exp(feat0, fz[:, 5:6])
        numw1 = premul_exp(feat1, fz[:, 4:5])
        return self.splat_packed(numw0, numw1, fz[:, 0:2], fz[:, 2:4])


class Warping:
    def __init__(self, key, in_channels=4, channels=(32, 64, 128, 256)):
        chans = [in_channels] + list(channels)
        self.half_warper = HalfWarper()
        self.feature_extractor = Extractor(key, chans)
        self.nedt = NEDT()

    def __call__(self, I0, I1, flow0to1, flow1to0, t=0.5):
        B, _, H, W = I0.shape
        t_vec = jnp.asarray(t, jnp.float32).reshape(-1)
        if t_vec.shape[0] == 1:
            t_vec = jnp.broadcast_to(t_vec, (B,))
        flow1tot, flow0tot = scale_flows(flow1to0, flow0to1, t_vec)   # bf16

        features0 = self.feature_extractor(I0)
        features1 = self.feature_extractor(I1)
        I0c = self.nedt(I0)     # == cat([I0, nedt(I0)], dim=1), fused, bf16
        I1c = self.nedt(I1)
        (z1to0, z0to1), (numw0, numw1) = HalfWarper.z_metric_and_premul(
            I0c, I1c, flow1to0, flow0to1)
        base0, base1 = self.half_warper.splat_packed(numw0, numw1, flow1tot, flow0tot)
        warped0, warped1 = [base0], [base1]

        # Pack [flow1tot, flow0tot, z1to0, z0to1] so each pyramid level needs ONE
        # resize launch (shared resize matrices, 4x fewer launches per level).
        fz = jnp.concatenate([flow1tot, flow0tot, z1to0, z0to1], axis=1)  # (B,6,H,W)
        for feat0, feat1 in zip(features0, features1):
            h, w = feat0.shape[2:]
            # TODO(synk): flow-displacement rescaling to the level resolution is part
            # of the softmax-splat stand-in geometry (the undefined HalfWarper would
            # otherwise consume full-resolution pixel offsets at reduced resolutions).
            scale = [w / W, h / H, w / W, h / H, 1.0, 1.0]
            fz_l = bilinear_resize(fz, h, w, channel_scale=scale)
            w0, w1 = self.half_warper(feat0, feat1, fz_l)
            warped0.append(w0)
            warped1.append(w1)
        return warped0, warped1


class Synthesis:
    # TODO(synk): real Synthesis is a UNet with window/grid attention over the warped
    # pyramid; stand-in fuses x, base-level warps and broadcast temb via two Pallas
    # 1x1 convs (NCHW, bf16 MXU, f32 accumulation, f32 final output).
    def __init__(self, key, in_channels, channels, temb_channels, hidden=32):
        c_in = in_channels + 2 * (in_channels + 1) + temb_channels
        k1, k2 = jax.random.split(key)
        self.w1 = (jax.random.normal(k1, (hidden, c_in), jnp.float32)
                   / np.sqrt(c_in)).astype(jnp.bfloat16)
        self.b1 = jnp.zeros((hidden, 1), jnp.float32)
        self.w2 = (jax.random.normal(k2, (in_channels, hidden), jnp.float32)
                   / np.sqrt(hidden)).astype(jnp.bfloat16)
        self.b2 = jnp.zeros((in_channels, 1), jnp.float32)

    def __call__(self, x, warp0, warp1, temb):
        B, _, H, W = x.shape
        temb_map = jnp.broadcast_to(temb[:, :, None, None], (B, temb.shape[1], H, W))
        h = jnp.concatenate([x.astype(jnp.bfloat16),
                             warp0[0].astype(jnp.bfloat16),
                             warp1[0].astype(jnp.bfloat16),
                             temb_map.astype(jnp.bfloat16)], axis=1)
        h = conv1x1(h, self.w1, self.b1, relu=True, out_dtype=jnp.bfloat16)
        return conv1x1(h, self.w2, self.b2, relu=False, out_dtype=jnp.float32)


class SofsplatResshift:
    def __init__(self, key, in_channels=3, channels=(32, 64, 128, 256), temb_channels=256):
        k1, k2 = jax.random.split(key)
        # TODO(synk): RAFT/PWC flow_model not implemented; `flows` must be provided.
        self.warping = Warping(k1, in_channels, channels)
        self.synthesis = Synthesis(k2, in_channels, channels, temb_channels)

    def __call__(self, x, Y, tau, temb, flows=None):
        assert flows is not None, "flow_model stand-in: pass precomputed flows"
        flow0to1, flow1to0 = flows
        warp0to1, warp1to0 = self.warping(Y[0], Y[1], flow0to1, flow1to0, tau[:, 0])
        return self.synthesis(x, warp0to1, warp1to0, temb)


# --------------------------------------------------------------------------- #
if __name__ == "__main__":
    key = jax.random.PRNGKey(0)
    kx, k0, k1, kf0, kf1, ktau, ktemb, kparams = jax.random.split(key, 8)

    B, Cin, H, W = 2, 3, 32, 32
    temb_ch = 32
    x = jax.random.normal(kx, (B, Cin, H, W), jnp.float32)
    I0 = jax.random.normal(k0, (B, Cin, H, W), jnp.float32)
    I1 = jax.random.normal(k1, (B, Cin, H, W), jnp.float32)
    flow0to1 = 3.0 * jax.random.normal(kf0, (B, 2, H, W), jnp.float32)
    flow1to0 = 3.0 * jax.random.normal(kf1, (B, 2, H, W), jnp.float32)
    tau = jax.random.uniform(ktau, (B, 1), jnp.float32)
    temb = jax.random.normal(ktemb, (B, temb_ch), jnp.float32)

    model = SofsplatResshift(kparams, in_channels=Cin, channels=(32, 64, 128, 256),
                             temb_channels=temb_ch)

    @jax.jit
    def run(x, I0, I1, tau, temb, f01, f10):
        return model(x, (I0, I1), tau, temb, flows=(f01, f10))

    out = run(x, I0, I1, tau, temb, flow0to1, flow1to0)
    jax.block_until_ready(out)
    assert out.shape == (B, Cin, H, W) and out.dtype == jnp.float32
    assert bool(jnp.all(jnp.isfinite(out)))
    print("KERNEL_OK")
</pallas_src>

<mosaic_0001>
module attributes {stable_mosaic.version = 11 : i64} {
  func.func private @main(%arg0: i32) attributes {dimension_semantics = [#tpu.dimension_semantics<core_parallel>], iteration_bounds = array<i64: 2>, tpu.core_type = #tpu.core_type<sc_scalar_subcore>, window_params = []} {
    return
  }
}

module attributes {stable_mosaic.version = 11 : i64} {
  func.func private @main(%arg0: i32) attributes {dimension_semantics = [#tpu.dimension_semantics<core_parallel>], iteration_bounds = array<i64: 2>, tpu.core_type = #tpu.core_type<sc_scalar_subcore>, window_params = []} {
    return
  }
}

module attributes {stable_mosaic.version = 11 : i64} {
  func.func @_scale_flows_kernel(%arg0: i32, %arg1: i32, %arg2: memref<2xf32, #tpu.memory_space<smem>>, %arg3: memref<1x2x512xf32, #tpu.memory_space<vmem>>, %arg4: memref<1x2x512xf32, #tpu.memory_space<vmem>>, %arg5: memref<1x2x512xbf16, #tpu.memory_space<vmem>>, %arg6: memref<1x2x512xbf16, #tpu.memory_space<vmem>>) attributes {dimension_semantics = [#tpu.dimension_semantics<parallel>, #tpu.dimension_semantics<parallel>], iteration_bounds = array<i64: 2, 2>, scalar_prefetch = 0 : i64, scratch_operands = 0 : i64, tpu.core_type = #tpu.core_type<tc>, window_params = [{transform_indices = @transform_0, window_bounds = array<i64: 2>}, {transform_indices = @transform_1, window_bounds = array<i64: 1, 2, 512>}, {transform_indices = @transform_2, window_bounds = array<i64: 1, 2, 512>}, {transform_indices = @transform_3, window_bounds = array<i64: 1, 2, 512>}, {transform_indices = @transform_4, window_bounds = array<i64: 1, 2, 512>}]} {
    %0 = arith.index_cast %arg0 : i32 to index
    %1 = memref.load %arg2[%0] : memref<2xf32, #tpu.memory_space<smem>>
    %cst = arith.constant 1.000000e+00 : f32
    %2 = arith.subf %cst, %1 : f32
    %c0 = arith.constant 0 : index
    %c0_0 = arith.constant 0 : index
    %c0_1 = arith.constant 0 : index
    %3 = vector.load %arg3[%c0, %c0_0, %c0_1] : memref<1x2x512xf32, #tpu.memory_space<vmem>>, vector<1x2x512xf32>
    %4 = vector.broadcast %2 : f32 to vector<1x2x512xf32>
    %5 = arith.mulf %4, %3 : vector<1x2x512xf32>
    %6 = arith.truncf %5 : vector<1x2x512xf32> to vector<1x2x512xbf16>
    %c0_2 = arith.constant 0 : index
    %c0_3 = arith.constant 0 : index
    %c0_4 = arith.constant 0 : index
    %7 = vector.load %arg5[%c0_2, %c0_3, %c0_4] : memref<1x2x512xbf16, #tpu.memory_space<vmem>>, vector<1x2x512xbf16>
    tpu.vector_store %arg5[%c0_2, %c0_3, %c0_4], %6 {strides = array<i32>} : memref<1x2x512xbf16, #tpu.memory_space<vmem>>, vector<1x2x512xbf16>,
    %c0_5 = arith.constant 0 : index
    %c0_6 = arith.constant 0 : index
    %c0_7 = arith.constant 0 : index
    %8 = vector.load %arg4[%c0_5, %c0_6, %c0_7] : memref<1x2x512xf32, #tpu.memory_space<vmem>>, vector<1x2x512xf32>
    %9 = vector.broadcast %1 : f32 to vector<1x2x512xf32>
    %10 = arith.mulf %9, %8 : vector<1x2x512xf32>
    %11 = arith.truncf %10 : vector<1x2x512xf32> to vector<1x2x512xbf16>
    %c0_8 = arith.constant 0 : index
    %c0_9 = arith.constant 0 : index
    %c0_10 = arith.constant 0 : index
    %12 = vector.load %arg6[%c0_8, %c0_9, %c0_10] : memref<1x2x512xbf16, #tpu.memory_space<vmem>>, vector<1x2x512xbf16>
    tpu.vector_store %arg6[%c0_8, %c0_9, %c0_10], %11 {strides = array<i32>} : memref<1x2x512xbf16, #tpu.memory_space<vmem>>, vector<1x2x512xbf16>,
    return
  }
  func.func @transform_0(%arg0: i32, %arg1: i32) -> i32 {
    %c0_i32 = arith.constant 0 : i32
    %c0_i32_0 = arith.constant 0 : i32
    return %c0_i32 : i32
  }
  func.func @transform_1(%arg0: i32, %arg1: i32) -> (i32, i32, i32) {
    %c0_i32 = arith.constant 0 : i32
    %c0_i32_0 = arith.constant 0 : i32
    return %arg0, %c0_i32, %arg1 : i32, i32, i32
  }
  func.func @transform_2(%arg0: i32, %arg1: i32) -> (i32, i32, i32) {
    %c0_i32 = arith.constant 0 : i32
    %c0_i32_0 = arith.constant 0 : i32
    return %arg0, %c0_i32, %arg1 : i32, i32, i32
  }
  func.func @transform_3(%arg0: i32, %arg1: i32) -> (i32, i32, i32) {
    %c0_i32 = arith.constant 0 : i32
    %c0_i32_0 = arith.constant 0 : i32
    return %arg0, %c0_i32, %arg1 : i32, i32, i32
  }
  func.func @transform_4(%arg0: i32, %arg1: i32) -> (i32, i32, i32) {
    %c0_i32 = arith.constant 0 : i32
    %c0_i32_0 = arith.constant 0 : i32
    return %arg0, %c0_i32, %arg1 : i32, i32, i32
  }
}

module attributes {stable_mosaic.version = 11 : i64} {
  func.func @_nedt_cat_kernel(%arg0: i32, %arg1: memref<1x3x32x32xf32, #tpu.memory_space<vmem>>, %arg2: memref<1x4x32x32xbf16, #tpu.memory_space<vmem>>) attributes {dimension_semantics = [#tpu.dimension_semantics<parallel>], iteration_bounds = array<i64: 2>, scalar_prefetch = 0 : i64, scratch_operands = 0 : i64, tpu.core_type = #tpu.core_type<tc>, window_params = [{transform_indices = @transform_0, window_bounds = array<i64: 1, 3, 32, 32>}, {transform_indices = @transform_1, window_bounds = array<i64: 1, 4, 32, 32>}]} {
    %c0 = arith.constant 0 : index
    %c0_0 = arith.constant 0 : index
    %c0_1 = arith.constant 0 : index
    %c0_2 = arith.constant 0 : index
    %0 = vector.load %arg1[%c0, %c0_0, %c0_1, %c0_2] : memref<1x3x32x32xf32, #tpu.memory_space<vmem>>, vector<1x3x32x32xf32>
    %1 = vector.shape_cast %0 : vector<1x3x32x32xf32> to vector<3x32x32xf32>
    %c1_i32 = arith.constant 1 : i32
    %2 = tpu.dynamic_rotate %1 by %c1_i32 dim 2 : vector<3x32x32xf32>, i32 -> vector<3x32x32xf32>
    %3 = arith.subf %1, %2 : vector<3x32x32xf32>
    %4 = math.absf %3 : vector<3x32x32xf32>
    %c1_i32_3 = arith.constant 1 : i32
    %5 = tpu.dynamic_rotate %1 by %c1_i32_3 dim 1 : vector<3x32x32xf32>, i32 -> vector<3x32x32xf32>
    %6 = arith.subf %1, %5 : vector<3x32x32xf32>
    %7 = math.absf %6 : vector<3x32x32xf32>
    %8 = tpu.iota {dimensions = array<i32: 1>} : vector<32x32xi32>
    %9 = tpu.iota {dimensions = array<i32: 0>} : vector<32x32xi32>
    %c0_i32 = arith.constant 0 : i32
    %10 = vector.broadcast %c0_i32 : i32 to vector<32x32xi32>
    %11 = arith.cmpi sgt, %8, %10 : vector<32x32xi32>
    %cst = arith.constant 0.000000e+00 : f32
    %12 = vector.shape_cast %11 : vector<32x32xi1> to vector<1x32x32xi1>
    %13 = vector.broadcast %12 : vector<1x32x32xi1> to vector<3x32x32xi1>
    %14 = vector.broadcast %cst : f32 to vector<3x32x32xf32>
    %15 = arith.select %13, %4, %14 : vector<3x32x32xi1>, vector<3x32x32xf32>
    %c0_i32_4 = arith.constant 0 : i32
    %16 = vector.broadcast %c0_i32_4 : i32 to vector<32x32xi32>
    %17 = arith.cmpi sgt, %9, %16 : vector<32x32xi32>
    %cst_5 = arith.constant 0.000000e+00 : f32
    %18 = vector.shape_cast %17 : vector<32x32xi1> to vector<1x32x32xi1>
    %19 = vector.broadcast %18 : vector<1x32x32xi1> to vector<3x32x32xi1>
    %20 = vector.broadcast %cst_5 : f32 to vector<3x32x32xf32>
    %21 = arith.select %19, %7, %20 : vector<3x32x32xi1>, vector<3x32x32xf32>
    %22 = arith.addf %15, %21 : vector<3x32x32xf32>
    %cst_6 = arith.constant dense<0.000000e+00> : vector<32x32xf32>
    %23 = vector.multi_reduction <add>, %22, %cst_6 [0] : vector<3x32x32xf32> to vector<32x32xf32>
    %24 = vector.shape_cast %23 : vector<32x32xf32> to vector<1x32x32xf32>
    %25 = arith.truncf %1 : vector<3x32x32xf32> to vector<3x32x32xbf16>
    %c0_7 = arith.constant 0 : index
    %c0_8 = arith.constant 0 : index
    %c0_9 = arith.constant 0 : index
    %c0_10 = arith.constant 0 : index
    %26 = vector.load %arg2[%c0_7, %c0_8, %c0_9, %c0_10] : memref<1x4x32x32xbf16, #tpu.memory_space<vmem>>, vector<1x3x32x32xbf16>
    %27 = vector.shape_cast %26 : vector<1x3x32x32xbf16> to vector<3x32x32xbf16>
    %28 = vector.shape_cast %25 : vector<3x32x32xbf16> to vector<1x3x32x32xbf16>
    tpu.vector_store %arg2[%c0_7, %c0_8, %c0_9, %c0_10], %28 {strides = array<i32>} : memref<1x4x32x32xbf16, #tpu.memory_space<vmem>>, vector<1x3x32x32xbf16>,
    %29 = math.tanh %24 : vector<1x32x32xf32>
    %30 = arith.truncf %29 : vector<1x32x32xf32> to vector<1x32x32xbf16>
    %c0_11 = arith.constant 0 : index
    %c3 = arith.constant 3 : index
    %c0_12 = arith.constant 0 : index
    %c0_13 = arith.constant 0 : index
    %31 = vector.load %arg2[%c0_11, %c3, %c0_12, %c0_13] : memref<1x4x32x32xbf16, #tpu.memory_space<vmem>>, vector<1x1x32x32xbf16>
    %32 = vector.shape_cast %31 : vector<1x1x32x32xbf16> to vector<1x32x32xbf16>
    %33 = vector.shape_cast %30 : vector<1x32x32xbf16> to vector<1x1x32x32xbf16>
    tpu.vector_store %arg2[%c0_11, %c3, %c0_12, %c0_13], %33 {strides = array<i32>} : memref<1x4x32x32xbf16, #tpu.memory_space<vmem>>, vector<1x1x32x32xbf16>,
    return
  }
  func.func @transform_0(%arg0: i32) -> (i32, i32, i32, i32) {
    %c0_i32 = arith.constant 0 : i32
    %c0_i32_0 = arith.constant 0 : i32
    %c0_i32_1 = arith.constant 0 : i32
    %c0_i32_2 = arith.constant 0 : i32
    return %arg0, %c0_i32, %c0_i32_0, %c0_i32_1 : i32, i32, i32, i32
  }
  func.func @transform_1(%arg0: i32) -> (i32, i32, i32, i32) {
    %c0_i32 = arith.constant 0 : i32
    %c0_i32_0 = arith.constant 0 : i32
    %c0_i32_1 = arith.constant 0 : i32
    %c0_i32_2 = arith.constant 0 : i32
    return %arg0, %c0_i32, %c0_i32_0, %c0_i32_1 : i32, i32, i32, i32
  }
}

module attributes {stable_mosaic.version = 11 : i64} {
  func.func @_photo_premul_kernel(%arg0: i32, %arg1: i32, %arg2: memref<1x4x512xbf16, #tpu.memory_space<vmem>>, %arg3: memref<1x4x512xbf16, #tpu.memory_space<vmem>>, %arg4: memref<1x1x512xbf16, #tpu.memory_space<vmem>>, %arg5: memref<1x5x512xbf16, #tpu.memory_space<vmem>>) attributes {dimension_semantics = [#tpu.dimension_semantics<parallel>, #tpu.dimension_semantics<parallel>], iteration_bounds = array<i64: 2, 2>, scalar_prefetch = 0 : i64, scratch_operands = 0 : i64, tpu.core_type = #tpu.core_type<tc>, window_params = [{transform_indices = @transform_0, window_bounds = array<i64: 1, 4, 512>}, {transform_indices = @transform_1, window_bounds = array<i64: 1, 4, 512>}, {transform_indices = @transform_2, window_bounds = array<i64: 1, 1, 512>}, {transform_indices = @transform_3, window_bounds = array<i64: 1, 5, 512>}]} {
    %c0 = arith.constant 0 : index
    %c0_0 = arith.constant 0 : index
    %c0_1 = arith.constant 0 : index
    %0 = vector.load %arg2[%c0, %c0_0, %c0_1] : memref<1x4x512xbf16, #tpu.memory_space<vmem>>, vector<1x4x512xbf16>
    %1 = vector.shape_cast %0 : vector<1x4x512xbf16> to vector<4x512xbf16>
    %2 = arith.extf %1 : vector<4x512xbf16> to vector<4x512xf32>
    %c0_2 = arith.constant 0 : index
    %c0_3 = arith.constant 0 : index
    %c0_4 = arith.constant 0 : index
    %3 = vector.load %arg3[%c0_2, %c0_3, %c0_4] : memref<1x4x512xbf16, #tpu.memory_space<vmem>>, vector<1x4x512xbf16>
    %4 = vector.shape_cast %3 : vector<1x4x512xbf16> to vector<4x512xbf16>
    %5 = arith.extf %4 : vector<4x512xbf16> to vector<4x512xf32>
    %6 = arith.subf %2, %5 : vector<4x512xf32>
    %7 = math.absf %6 : vector<4x512xf32>
    %cst = arith.constant dense<0.000000e+00> : vector<512xf32>
    %8 = vector.multi_reduction <add>, %7, %cst [0] : vector<4x512xf32> to vector<512xf32>
    %9 = vector.shape_cast %8 : vector<512xf32> to vector<1x512xf32>
    %cst_5 = arith.constant 4.000000e+00 : f32
    %10 = vector.broadcast %cst_5 : f32 to vector<1x512xf32>
    %11 = arith.divf %9, %10 : vector<1x512xf32>
    %cst_6 = arith.constant -2.000000e+01 : f32
    %12 = vector.broadcast %cst_6 : f32 to vector<1x512xf32>
    %13 = arith.mulf %12, %11 : vector<1x512xf32>
    %14 = math.exp %13 : vector<1x512xf32>
    %15 = arith.truncf %13 : vector<1x512xf32> to vector<1x512xbf16>
    %c0_7 = arith.constant 0 : index
    %c0_8 = arith.constant 0 : index
    %c0_9 = arith.constant 0 : index
    %16 = vector.load %arg4[%c0_7, %c0_8, %c0_9] : memref<1x1x512xbf16, #tpu.memory_space<vmem>>, vector<1x1x512xbf16>
    %17 = vector.shape_cast %16 : vector<1x1x512xbf16> to vector<1x512xbf16>
    %18 = vector.shape_cast %15 : vector<1x512xbf16> to vector<1x1x512xbf16>
    tpu.vector_store %arg4[%c0_7, %c0_8, %c0_9], %18 {strides = array<i32>} : memref<1x1x512xbf16, #tpu.memory_space<vmem>>, vector<1x1x512xbf16>,
    %19 = vector.broadcast %14 : vector<1x512xf32> to vector<4x512xf32>
    %20 = arith.mulf %2, %19 : vector<4x512xf32>
    %21 = arith.truncf %20 : vector<4x512xf32> to vector<4x512xbf16>
    %c0_10 = arith.constant 0 : index
    %c0_11 = arith.constant 0 : index
    %c0_12 = arith.constant 0 : index
    %22 = vector.load %arg5[%c0_10, %c0_11, %c0_12] : memref<1x5x512xbf16, #tpu.memory_space<vmem>>, vector<1x4x512xbf16>
    %23 = vector.shape_cast %22 : vector<1x4x512xbf16> to vector<4x512xbf16>
    %24 = vector.shape_cast %21 : vector<4x512xbf16> to vector<1x4x512xbf16>
    tpu.vector_store %arg5[%c0_10, %c0_11, %c0_12], %24 {strides = array<i32>} : memref<1x5x512xbf16, #tpu.memory_space<vmem>>, vector<1x4x512xbf16>,
    %25 = arith.truncf %14 : vector<1x512xf32> to vector<1x512xbf16>
    %c0_13 = arith.constant 0 : index
    %c4 = arith.constant 4 : index
    %c0_14 = arith.constant 0 : index
    %26 = vector.load %arg5[%c0_13, %c4, %c0_14] : memref<1x5x512xbf16, #tpu.memory_space<vmem>>, vector<1x1x512xbf16>
    %27 = vector.shape_cast %26 : vector<1x1x512xbf16> to vector<1x512xbf16>
    %28 = vector.shape_cast %25 : vector<1x512xbf16> to vector<1x1x512xbf16>
    tpu.vector_store %arg5[%c0_13, %c4, %c0_14], %28 {strides = array<i32>} : memref<1x5x512xbf16, #tpu.memory_space<vmem>>, vector<1x1x512xbf16>,
    return
  }
  func.func @transform_0(%arg0: i32, %arg1: i32) -> (i32, i32, i32) {
    %c0_i32 = arith.constant 0 : i32
    %c0_i32_0 = arith.constant 0 : i32
    return %arg0, %c0_i32, %arg1 : i32, i32, i32
  }
  func.func @transform_1(%arg0: i32, %arg1: i32) -> (i32, i32, i32) {
    %c0_i32 = arith.constant 0 : i32
    %c0_i32_0 = arith.constant 0 : i32
    return %arg0, %c0_i32, %arg1 : i32, i32, i32
  }
  func.func @transform_2(%arg0: i32, %arg1: i32) -> (i32, i32, i32) {
    %c0_i32 = arith.constant 0 : i32
    %c0_i32_0 = arith.constant 0 : i32
    return %arg0, %c0_i32, %arg1 : i32, i32, i32
  }
  func.func @transform_3(%arg0: i32, %arg1: i32) -> (i32, i32, i32) {
    %c0_i32 = arith.constant 0 : i32
    %c0_i32_0 = arith.constant 0 : i32
    return %arg0, %c0_i32, %arg1 : i32, i32, i32
  }
}

module attributes {stable_mosaic.version = 11 : i64} {
  func.func @_normalize_kernel(%arg0: i32, %arg1: i32, %arg2: memref<1x5x512xf32, #tpu.memory_space<vmem>>, %arg3: memref<1x4x512xbf16, #tpu.memory_space<vmem>>) attributes {dimension_semantics = [#tpu.dimension_semantics<parallel>, #tpu.dimension_semantics<parallel>], iteration_bounds = array<i64: 2, 2>, scalar_prefetch = 0 : i64, scratch_operands = 0 : i64, tpu.core_type = #tpu.core_type<tc>, window_params = [{transform_indices = @transform_0, window_bounds = array<i64: 1, 5, 512>}, {transform_indices = @transform_1, window_bounds = array<i64: 1, 4, 512>}]} {
    %c0 = arith.constant 0 : index
    %c0_0 = arith.constant 0 : index
    %c0_1 = arith.constant 0 : index
    %0 = vector.load %arg2[%c0, %c0_0, %c0_1] : memref<1x5x512xf32, #tpu.memory_space<vmem>>, vector<1x4x512xf32>
    %1 = vector.shape_cast %0 : vector<1x4x512xf32> to vector<4x512xf32>
    %c0_2 = arith.constant 0 : index
    %c4 = arith.constant 4 : index
    %c0_3 = arith.constant 0 : index
    %2 = vector.load %arg2[%c0_2, %c4, %c0_3] : memref<1x5x512xf32, #tpu.memory_space<vmem>>, vector<1x1x512xf32>
    %3 = vector.shape_cast %2 : vector<1x1x512xf32> to vector<1x512xf32>
    %cst = arith.constant 1.000000e-07 : f32
    %4 = vector.broadcast %cst : f32 to vector<1x512xf32>
    %5 = arith.addf %3, %4 : vector<1x512xf32>
    %6 = tpu.reciprocal %5 {approx = true} : vector<1x512xf32> -> vector<1x512xf32>
    %7 = vector.broadcast %6 : vector<1x512xf32> to vector<4x512xf32>
    %8 = arith.mulf %1, %7 : vector<4x512xf32>
    %9 = arith.truncf %8 : vector<4x512xf32> to vector<4x512xbf16>
    %c0_4 = arith.constant 0 : index
    %c0_5 = arith.constant 0 : index
    %c0_6 = arith.constant 0 : index
    %10 = vector.load %arg3[%c0_4, %c0_5, %c0_6] : memref<1x4x512xbf16, #tpu.memory_space<vmem>>, vector<1x4x512xbf16>
    %11 = vector.shape_cast %10 : vector<1x4x512xbf16> to vector<4x512xbf16>
    %12 = vector.shape_cast %9 : vector<4x512xbf16> to vector<1x4x512xbf16>
    tpu.vector_store %arg3[%c0_4, %c0_5, %c0_6], %12 {strides = array<i32>} : memref<1x4x512xbf16, #tpu.memory_space<vmem>>, vector<1x4x512xbf16>,
    return
  }
  func.func @transform_0(%arg0: i32, %arg1: i32) -> (i32, i32, i32) {
    %c0_i32 = arith.constant 0 : i32
    %c0_i32_0 = arith.constant 0 : i32
    return %arg0, %c0_i32, %arg1 : i32, i32, i32
  }
  func.func @transform_1(%arg0: i32, %arg1: i32) -> (i32, i32, i32) {
    %c0_i32 = arith.constant 0 : i32
    %c0_i32_0 = arith.constant 0 : i32
    return %arg0, %c0_i32, %arg1 : i32, i32, i32
  }
}

module attributes {stable_mosaic.version = 11 : i64} {
  func.func @_conv1x1_kernel(%arg0: i32, %arg1: i32, %arg2: memref<1x43x512xbf16, #tpu.memory_space<vmem>>, %arg3: memref<32x43xbf16, #tpu.memory_space<vmem>>, %arg4: memref<32x1xf32, #tpu.memory_space<vmem>>, %arg5: memref<1x32x512xbf16, #tpu.memory_space<vmem>>) attributes {dimension_semantics = [#tpu.dimension_semantics<parallel>, #tpu.dimension_semantics<parallel>], iteration_bounds = array<i64: 2, 2>, scalar_prefetch = 0 : i64, scratch_operands = 0 : i64, tpu.core_type = #tpu.core_type<tc>, window_params = [{transform_indices = @transform_0, window_bounds = array<i64: 1, 43, 512>}, {pipeline_mode = #tpu.pipeline_mode<synchronous>, transform_indices = @transform_1, window_bounds = array<i64: 32, 43>}, {pipeline_mode = #tpu.pipeline_mode<synchronous>, transform_indices = @transform_2, window_bounds = array<i64: 32, 1>}, {transform_indices = @transform_3, window_bounds = array<i64: 1, 32, 512>}]} {
    %c0 = arith.constant 0 : index
    %c0_0 = arith.constant 0 : index
    %0 = vector.load %arg3[%c0, %c0_0] : memref<32x43xbf16, #tpu.memory_space<vmem>>, vector<32x43xbf16>
    %c0_1 = arith.constant 0 : index
    %c0_2 = arith.constant 0 : index
    %c0_3 = arith.constant 0 : index
    %1 = vector.load %arg2[%c0_1, %c0_2, %c0_3] : memref<1x43x512xbf16, #tpu.memory_space<vmem>>, vector<1x43x512xbf16>
    %2 = vector.shape_cast %1 : vector<1x43x512xbf16> to vector<43x512xbf16>
    %cst = arith.constant dense<0.000000e+00> : vector<32x512xf32>
    %3 = tpu.matmul %0, %2, %cst {dimension_numbers = #tpu.dot_dimension_numbers<[1], [0], [0], [1], [0, 0, 1, 1], [], []>} : vector<32x43xbf16>, vector<43x512xbf16>, vector<32x512xf32> -> vector<32x512xf32>
    %c0_4 = arith.constant 0 : index
    %c0_5 = arith.constant 0 : index
    %4 = vector.load %arg4[%c0_4, %c0_5] : memref<32x1xf32, #tpu.memory_space<vmem>>, vector<32x1xf32>
    %5 = vector.broadcast %4 : vector<32x1xf32> to vector<32x512xf32>
    %6 = arith.addf %3, %5 : vector<32x512xf32>
    %cst_6 = arith.constant 0.000000e+00 : f32
    %7 = vector.broadcast %cst_6 : f32 to vector<32x512xf32>
    %8 = arith.maximumf %6, %7 : vector<32x512xf32>
    %9 = arith.truncf %8 : vector<32x512xf32> to vector<32x512xbf16>
    %c0_7 = arith.constant 0 : index
    %c0_8 = arith.constant 0 : index
    %c0_9 = arith.constant 0 : index
    %10 = vector.load %arg5[%c0_7, %c0_8, %c0_9] : memref<1x32x512xbf16, #tpu.memory_space<vmem>>, vector<1x32x512xbf16>
    %11 = vector.shape_cast %10 : vector<1x32x512xbf16> to vector<32x512xbf16>
    %12 = vector.shape_cast %9 : vector<32x512xbf16> to vector<1x32x512xbf16>
    tpu.vector_store %arg5[%c0_7, %c0_8, %c0_9], %12 {strides = array<i32>} : memref<1x32x512xbf16, #tpu.memory_space<vmem>>, vector<1x32x512xbf16>,
    return
  }
  func.func @transform_0(%arg0: i32, %arg1: i32) -> (i32, i32, i32) {
    %c0_i32 = arith.constant 0 : i32
    %c0_i32_0 = arith.constant 0 : i32
    return %arg0, %c0_i32, %arg1 : i32, i32, i32
  }
  func.func @transform_1(%arg0: i32, %arg1: i32) -> (i32, i32) {
    %c0_i32 = arith.constant 0 : i32
    %c0_i32_0 = arith.constant 0 : i32
    %c0_i32_1 = arith.constant 0 : i32
    return %c0_i32, %c0_i32_0 : i32, i32
  }
  func.func @transform_2(%arg0: i32, %arg1: i32) -> (i32, i32) {
    %c0_i32 = arith.constant 0 : i32
    %c0_i32_0 = arith.constant 0 : i32
    %c0_i32_1 = arith.constant 0 : i32
    return %c0_i32, %c0_i32_0 : i32, i32
  }
  func.func @transform_3(%arg0: i32, %arg1: i32) -> (i32, i32, i32) {
    %c0_i32 = arith.constant 0 : i32
    %c0_i32_0 = arith.constant 0 : i32
    return %arg0, %c0_i32, %arg1 : i32, i32, i32
  }
}

module attributes {stable_mosaic.version = 11 : i64} {
  func.func @_conv1x1_kernel(%arg0: i32, %arg1: i32, %arg2: memref<1x32x512xbf16, #tpu.memory_space<vmem>>, %arg3: memref<3x32xbf16, #tpu.memory_space<vmem>>, %arg4: memref<3x1xf32, #tpu.memory_space<vmem>>, %arg5: memref<1x3x512xf32, #tpu.memory_space<vmem>>) attributes {dimension_semantics = [#tpu.dimension_semantics<parallel>, #tpu.dimension_semantics<parallel>], iteration_bounds = array<i64: 2, 2>, scalar_prefetch = 0 : i64, scratch_operands = 0 : i64, tpu.core_type = #tpu.core_type<tc>, window_params = [{transform_indices = @transform_0, window_bounds = array<i64: 1, 32, 512>}, {pipeline_mode = #tpu.pipeline_mode<synchronous>, transform_indices = @transform_1, window_bounds = array<i64: 3, 32>}, {pipeline_mode = #tpu.pipeline_mode<synchronous>, transform_indices = @transform_2, window_bounds = array<i64: 3, 1>}, {transform_indices = @transform_3, window_bounds = array<i64: 1, 3, 512>}]} {
    %c0 = arith.constant 0 : index
    %c0_0 = arith.constant 0 : index
    %0 = vector.load %arg3[%c0, %c0_0] : memref<3x32xbf16, #tpu.memory_space<vmem>>, vector<3x32xbf16>
    %c0_1 = arith.constant 0 : index
    %c0_2 = arith.constant 0 : index
    %c0_3 = arith.constant 0 : index
    %1 = vector.load %arg2[%c0_1, %c0_2, %c0_3] : memref<1x32x512xbf16, #tpu.memory_space<vmem>>, vector<1x32x512xbf16>
    %2 = vector.shape_cast %1 : vector<1x32x512xbf16> to vector<32x512xbf16>
    %cst = arith.constant dense<0.000000e+00> : vector<3x512xf32>
    %3 = tpu.matmul %0, %2, %cst {dimension_numbers = #tpu.dot_dimension_numbers<[1], [0], [0], [1], [0, 0, 1, 1], [], []>} : vector<3x32xbf16>, vector<32x512xbf16>, vector<3x512xf32> -> vector<3x512xf32>
    %c0_4 = arith.constant 0 : index
    %c0_5 = arith.constant 0 : index
    %4 = vector.load %arg4[%c0_4, %c0_5] : memref<3x1xf32, #tpu.memory_space<vmem>>, vector<3x1xf32>
    %5 = vector.broadcast %4 : vector<3x1xf32> to vector<3x512xf32>
    %6 = arith.addf %3, %5 : vector<3x512xf32>
    %c0_6 = arith.constant 0 : index
    %c0_7 = arith.constant 0 : index
    %c0_8 = arith.constant 0 : index
    %7 = vector.load %arg5[%c0_6, %c0_7, %c0_8] : memref<1x3x512xf32, #tpu.memory_space<vmem>>, vector<1x3x512xf32>
    %8 = vector.shape_cast %7 : vector<1x3x512xf32> to vector<3x512xf32>
    %9 = vector.shape_cast %6 : vector<3x512xf32> to vector<1x3x512xf32>
    tpu.vector_store %arg5[%c0_6, %c0_7, %c0_8], %9 {strides = array<i32>} : memref<1x3x512xf32, #tpu.memory_space<vmem>>, vector<1x3x512xf32>,
    return
  }
  func.func @transform_0(%arg0: i32, %arg1: i32) -> (i32, i32, i32) {
    %c0_i32 = arith.constant 0 : i32
    %c0_i32_0 = arith.constant 0 : i32
    return %arg0, %c0_i32, %arg1 : i32, i32, i32
  }
  func.func @transform_1(%arg0: i32, %arg1: i32) -> (i32, i32) {
    %c0_i32 = arith.constant 0 : i32
    %c0_i32_0 = arith.constant 0 : i32
    %c0_i32_1 = arith.constant 0 : i32
    return %c0_i32, %c0_i32_0 : i32, i32
  }
  func.func @transform_2(%arg0: i32, %arg1: i32) -> (i32, i32) {
    %c0_i32 = arith.constant 0 : i32
    %c0_i32_0 = arith.constant 0 : i32
    %c0_i32_1 = arith.constant 0 : i32
    return %c0_i32, %c0_i32_0 : i32, i32
  }
  func.func @transform_3(%arg0: i32, %arg1: i32) -> (i32, i32, i32) {
    %c0_i32 = arith.constant 0 : i32
    %c0_i32_0 = arith.constant 0 : i32
    return %arg0, %c0_i32, %arg1 : i32, i32, i32
  }
}

</mosaic_0001>

<bundles_post_ra>
// kernel: run.9
= control target key start
LH: loop header
LB: loop body
LE: loop exit
PB: predicated region body
PF: predicated region fallthrough
CT: control target
= control target key end

     0   :  { %10 = vsyncpa [#allocation3], 0  ;;  %s750_s15 = smov 0   ;;  %s752_s16 = smov 0   ;;  %s842_s0 = inlined_call_operand.vmem [shape: f32[2], index: 0, kind: input, shape index: {}]   ;;  %s843_s1 = inlined_call_operand.vmem [shape: f32[2,2,1024], index: 1, kind: input, shape index: {}]   ;;  %s844_s2 = inlined_call_operand.vmem [shape: f32[2,2,1024], index: 2, kind: input, shape index: {}]   ;;  %s845_s3 = inlined_call_operand.vmem [shape: bf16[2,2,1024], index: 3, kind: output, shape index: {0}]   ;;  %s846_s4 = inlined_call_operand.vmem [shape: bf16[2,2,1024], index: 4, kind: output, shape index: {1}]  }
   0x1   :  { %s754_s17 = smov 0   ;;  %s756_s18 = smov 0  }
   0x2   :  { %s758_s19 = smov 0  }
   0x3 LB: > { %s585_s20 = sadd.s32 4294967295, %s720_s19   ;;  %s25_s21 = sadd.s32 1, %s712_s17  ;;  %s720_s19 = sphi %s758_s19, %s16_s19   ;;  %s716_s18 = sphi %s756_s18, %s852_s18   ;;  %s712_s17 = sphi %s754_s17, %s851_s17   ;;  %s708_s16 = sphi %s752_s16, %s850_s16   ;;  %s704_s15 = sphi %s750_s15, %s849_s15  }
   0x4   : > { %p26_p0 = scmp.ge.s32.totalorder %s25_s21, 2  ;;  %s28_s22 = sadd.s32 1, %s716_s18 }
   0x5   : > { %p587_p1 = scmp.ge.s32.totalorder %s720_s19, 1  ;;  %p166_p2 = scmp.lt.s32.totalorder %s720_s19, 5 }
   0x6   : > { %s854_s21 = smov (%p26_p0, %s25_s21), 0  ;;  %s856_s22 = smov (!%p26_p0, %s28_s22), %s716_s18 }
   0x7   : > { %p783_p3 = pnand %p587_p1, %p166_p2  ;;  %p30_p4 = scmp.ge.s32.totalorder %s856_s22, 2 }
   0x8   : > { %p787_p5 = scmp.eq.s32.totalorder %s585_s20, 0  ;;  %s179_s27 = sshll.u32 %s842_s0, 4  ;;  %s180_s27 = int_to_ptr.vmem [resolvable:$true] %s179_s27 }
   0x9   : > { %p614_p6 = pneg %p783_p3  ;;  %s858_s22 = smov (%p30_p4, %s856_s22), 0 }
   0xa   : > { %s663_s28 = scalar_lea.vmem %s180_s27, 16  ;;  %p671_p12 = scmp.lt.s32.totalorder %s180_s27, %s180_s27 }
   0xb   : > { %p615_p7 = pnand %p787_p5, %p614_p6  ;;  %p664_p8 = scmp.ne.s32.totalorder %s180_s27, %s663_s28 }
   0xc   : > { %p672_p13 = scmp.lt.s32.totalorder %s663_s28, %s663_s28 }
   0xd   : > { %p665_p9 = pneg %p615_p7 }
   0xe   : > { %p673_p0 = por %p672_p13, %p671_p12 }
   0xf   : > { %p666_p10 = pnand %p665_p9, %p664_p8 }
  0x11   : > { %p667_p11 = pneg %p666_p10 }
  0x13   : > { %p674_p1 = pnand %p673_p0, %p667_p11 }
  0x15   : > { %677 = shalt.err (!%p674_p1)
}
  0x16   : > { %s722_s29 = smov [#allocation2]   ;;  %218 = sbr.rel (%p783_p3) target bundleno = 57 (0x39), region = 32 }
  0x17   : > { %617 = dma.vmem_to_smem (!%p615_p7), %s180_s27, 16, %s722_s29, [#allocation3]  }
  0x1d   : > { %699 = dma.done.wait (%p787_p5), [#allocation3], 16  }
  0x1e   : > { %701 = vsyncadd (%p787_p5), [#allocation3], 4294967280 }
  0x1f   : > { %224 = sfence }
  0x20   : > { %s592_s30 = sshll.u32 %s704_s15, 2  ;;  %p270_p2 = scmp.lt.s32.totalorder %s708_s16, 1  ;;  %v317_v0 = vlaneseq  ;;  %v723_v1 = vmov 1983009808   ;;  %v724_v5 = vmov 1966171168  }
  0x21   : > { %p272_p4 = scmp.lt.s32.totalorder %s592_s30, 7  ;;  %s307_s5 = sld [smem:[#allocation2 + %s708_s16]]  ;;  %v315_v2 = vunpack.c.l.s4 %v723_v1  ;;  %v345_v6 = vunpack.c.l.s4 %v724_v5 }
  0x22   : > { %s860_s16 = smov (!%p270_p2, %s708_s16), 1  ;;  %v318_v4 = vshrl.u32 %v317_v0, 7 }
  0x23   : > { %s862_s30 = smov (!%p272_p4, %s592_s30), 7  ;;  %v316_v3 = vunpack.c.0.s8 %v315_v2  ;;  %s593_s6 = sshll.u32 %s860_s16, 3  ;;  %v346_v10 = vunpack.c.0.s8 %v345_v6 }
  0x24   : > { %s810_s7 = sadd.s32 %s593_s6, %s862_s30 }
  0x25   : > { %s594_s8 = sshll.u32 %s810_s7, 1  ;;  %v319_v7 = vsub.s32 %v316_v3, %v318_v4  ;;  %v349_v17 = vsub.s32 %v346_v10, %v318_v4  ;;  %s305_s23 = scalar_lea.vmem %s846_s4, %s810_s7 }
  0x26   : > { %s277_s11 = scalar_lea.vmem %s843_s1, %s594_s8  ;;  %s287_s14 = scalar_lea.vmem %s844_s2, %s594_s8 }
  0x27   : > { %v369_v8 = vstv %s307_s5  ;;  %s308_s15 = ssub.f32 1.0, %s307_s5  ;;  %v309_v9 = vld [vmem:[%s277_s11] sm:$0xff]  ;;  %s296_s26 = scalar_lea.vmem %s845_s3, %s810_s7 }
  0x28   : > { %v368_v11 = vld [vmem:[%s287_s14] sm:$0xff] }
  0x29   : > { %v370_v12 = vmul.f32 %v369_v8, %v368_v11  ;;  %v310_v13 = vstv %s308_s15 }
  0x2a   : > { %v311_v14 = vmul.f32 %v310_v13, %v309_v9 }
  0x2b   : > { %v372_v15 = vcombine.high %v370_v12, %v370_v12  ;;  %v379_v16 = vrot.slane %v370_v12, %v319_v7 }
  0x2c   : > { %v313_v18 = vcombine.high %v311_v14, %v311_v14  ;;  %v320_v19 = vrot.slane %v311_v14, %v319_v7 }
  0x2d   : > { %v386_v20 = vrot.slane %v372_v15, %v319_v7  ;;  %v387_v21 = vcombine.high %v379_v16, %v379_v16 }
  0x2e   : > { %v327_v22 = vrot.slane %v313_v18, %v319_v7  ;;  %v328_v23 = vcombine.high %v320_v19, %v320_v19 }
  0x2f   : > { %v388_v24 = vcombine.high %v386_v20, %v386_v20  ;;  %v605_v25 = vpack.c.bf16 %v387_v21, %v379_v16 }
  0x30   : > { %v329_v26 = vcombine.high %v327_v22, %v327_v22  ;;  %v602_v27 = vpack.c.bf16 %v328_v23, %v320_v19 }
  0x31   : > { %v606_v28 = vpack.c.bf16 %v388_v24, %v386_v20  ;;  %v409_v29 = vrot.slane %v605_v25, %v349_v17 }
  0x32   : > { %v603_v30 = vpack.c.bf16 %v329_v26, %v327_v22  ;;  %v350_v31 = vrot.slane %v602_v27, %v349_v17 }
  0x33   : > { %v416_v32 = vrot.slane %v606_v28, %v349_v17 }
  0x34   : > { %v357_v33 = vrot.slane %v603_v30, %v349_v17 }
  0x35   : > { %v417_v34 = vcombine.low %v409_v29, %v416_v32 }
  0x36   : > { %v358_v35 = vcombine.low %v350_v31, %v357_v33 }
  0x37   : > { %607 = vst.sshfl [vmem:[%s305_s23] sm:$0x55 pattern:$0x73625140] %v417_v34 }
  0x38   : > { %604 = vst.sshfl [vmem:[%s296_s26] sm:$0x55 pattern:$0x73625140] %v358_v35 }
  0x39 PF: > { %s16_s19 = sadd.s32 1, %s720_s19   ;;  %s849_s15 = smov %s712_s17 }
  0x3a   : > { %p13_p3 = scmp.ge.s32.totalorder %s16_s19, 6   ;;  %s850_s16 = smov %s716_s18 }
  0x3b   : > { %s851_s17 = smov %s854_s21  ;;  %s852_s18 = smov %s858_s22 }
  0x3c   :  { %15 = sbr.rel (!%p13_p3) target bundleno = 3 (0x3), region = 82 }
  0x43   :  { %478 = vsyncpa [#allocation3], 1 }
  0x44   :  { %480 = vsyncpa [#allocation3 + $0x1], 1 }

// kernel: run.11
= control target key start
LH: loop header
LB: loop body
LE: loop exit
PB: predicated region body
PF: predicated region fallthrough
CT: control target
= control target key end

     0   :  { %s629_s6 = smov 0   ;;  %s950_s0 = inlined_call_operand.vmem [shape: f32[2,3,32,32], index: 0, kind: input, shape index: {}]   ;;  %s951_s1 = inlined_call_operand.vmem [shape: bf16[2,4,32,32], index: 1, kind: output, shape index: {}]  }
   0x1 LB: > { %s543_s7 = sadd.s32 4294967295, %s615_s6   ;;  %p547_p0 = scmp.ge.s32.totalorder %s615_s6, 1  ;;  %s615_s6 = sphi %s629_s6, %s11_s6  }
   0x2   : > { %p87_p1 = scmp.lt.s32.totalorder %s615_s6, 3 }
   0x4   : > { %p88_p2 = pnand %p547_p0, %p87_p1 }
   0x5   : > { %p107_p3 = scmp.lt.s32.totalorder (!%p88_p2), %s543_s7, 1  ;;  %s617_s13 = smov (!%p88_p2), 32   ;;  %vm450_vm0 = vcmask (!%p88_p2), 257024   ;;  %vm129_vm1 = vcmask (!%p88_p2), 1047808   ;;  %vm381_vm5 = vcmask (!%p88_p2), 261120  }
   0x6   : > { %91 = sbr.rel (%p88_p2) target bundleno = 413 (0x19d), region = 24  ;;  %s618_s17 = smov (!%p88_p2), 97  }
   0xd   : > { %s953_s7 = smov (!%p107_p3, %s543_s7), 1 }
   0xe   : > { %s590_s8 = smul.u32 96, %s953_s7  ;;  %s573_s12 = sshll.u32 %s953_s7, 6 }
   0xf   : > { %s670_s16 = scalar_lea.vmem %s951_s1, %s573_s12 }
  0x10   : > { %s640_s11 = scalar_lea.vmem %s950_s0, %s590_s8 }
  0x11   : > { %v643_v0 = vld [vmem:[%s640_s11] sm:$0xff]  ;;  %v646_v1 = vld [vmem:[%s640_s11 + $0x10] sm:$0xff]  ;;  %v649_v2 = vld [vmem:[%s640_s11 + $0x8] sm:$0xff] }
  0x12   : > { %130 = vrot.lane.b32.xlu0 %v643_v0, %s617_s13  ;;  %v574_v3 = vpack.c.bf16 %v643_v0, %v643_v0  ;;  %136 = vrot.lane.b32.xlu1 %v646_v1, %s617_s13  ;;  %v576_v4 = vpack.c.bf16 %v646_v1, %v646_v1  ;;  %v575_v5 = vpack.c.bf16 %v649_v2, %v649_v2  ;;  %v662_v6 = vld [vmem:[%s640_s11 + $0x18] sm:$0xff]  ;;  %v665_v7 = vld [vmem:[%s640_s11 + $0x20] sm:$0xff] }
  0x13   : > { %v577_v8 = vpack.c.bf16 %v662_v6, %v662_v6  ;;  %v578_v9 = vpack.c.bf16 %v665_v7, %v665_v7  ;;  %v677_v10 = vld [vmem:[%s640_s11 + $0x28] sm:$0xff]  ;;  %v680_v11 = vld [vmem:[%s640_s11 + $0x30] sm:$0xff]  ;;  %v683_v12 = vld [vmem:[%s640_s11 + $0x38] sm:$0xff] }
  0x14   : > { %451 = vst.msk [vmem:[%s670_s16] sm:$0xf] %vm450_vm0, %v574_v3  ;;  %453 = vst.msk [vmem:[%s670_s16 + $0x8] sm:$0xf] %vm450_vm0, %v576_v4  ;;  %v579_v13 = vpack.c.bf16 %v677_v10, %v677_v10  ;;  %v580_v14 = vpack.c.bf16 %v680_v11, %v680_v11  ;;  %v581_v15 = vpack.c.bf16 %v683_v12, %v683_v12  ;;  %v698_v16 = vld [vmem:[%s640_s11 + $0x40] sm:$0xff]  ;;  %v701_v17 = vld [vmem:[%s640_s11 + $0x48] sm:$0xff] }
  0x15   : > { %452 = vst.msk [vmem:[%s670_s16 + $0x4] sm:$0xf] %vm450_vm0, %v575_v5  ;;  %v704_v18 = vld [vmem:[%s640_s11 + $0x50] sm:$0xff]  ;;  %454 = vst.msk [vmem:[%s670_s16 + $0xc] sm:$0xf] %vm450_vm0, %v577_v8  ;;  %v582_v19 = vpack.c.bf16 %v698_v16, %v698_v16  ;;  %v583_v20 = vpack.c.bf16 %v701_v17, %v701_v17  ;;  %v717_v22 = vld [vmem:[%s640_s11 + $0x58] sm:$0xff] }
  0x16   : > { %455 = vst.msk [vmem:[%s670_s16 + $0x10] sm:$0xf] %vm450_vm0, %v578_v9  ;;  %v584_v21 = vpack.c.bf16 %v704_v18, %v704_v18  ;;  %133 = vrot.lane.b32.xlu0 %v649_v2, %s617_s13  ;;  %139 = vrot.lane.b32.xlu1 %v662_v6, %s617_s13  ;;  %456 = vst.msk [vmem:[%s670_s16 + $0x14] sm:$0xf] %vm450_vm0, %v579_v13  ;;  %v585_v23 = vpack.c.bf16 %v717_v22, %v717_v22 }
  0x17   : > { %457 = vst.msk [vmem:[%s670_s16 + $0x18] sm:$0xf] %vm450_vm0, %v580_v14  ;;  %458 = vst.msk [vmem:[%s670_s16 + $0x1c] sm:$0xf] %vm450_vm0, %v581_v15 }
  0x18   : > { %459 = vst.msk [vmem:[%s670_s16 + $0x20] sm:$0xf] %vm450_vm0, %v582_v19  ;;  %460 = vst.msk [vmem:[%s670_s16 + $0x24] sm:$0xf] %vm450_vm0, %v583_v20  ;;  %v286_v19 = vlaneseq }
  0x19   : > { %461 = vst.msk [vmem:[%s670_s16 + $0x28] sm:$0xf] %vm450_vm0, %v584_v21  ;;  %462 = vst.msk [vmem:[%s670_s16 + $0x2c] sm:$0xf] %vm450_vm0, %v585_v23  ;;  %v283_v21 = vrot.slane %v662_v6, 7  ;;  %v274_v23 = vrot.slane %v643_v0, 7 }
  0x1a   : > { %142 = vrot.lane.b32.xlu0 %v665_v7, %s617_s13  ;;  %145 = vrot.lane.b32.xlu1 %v677_v10, %s617_s13  ;;  %v827_v20 = vshrl.u32 %v286_v19, 7 }
  0x1c   : > { %vm288_vm2 = vcmp.lt.s32.totalorder %v827_v20, 1  ;;  %vm345_vm3 = vcmp.gt.s32.totalorder %v827_v20, 0 }
  0x1e   : > { %148 = vrot.lane.b32.xlu0 %v680_v11, %s617_s13  ;;  %151 = vrot.lane.b32.xlu1 %v683_v12, %s617_s13 }
  0x22   : > { %154 = vrot.lane.b32.xlu0 %v698_v16, %s617_s13  ;;  %157 = vrot.lane.b32.xlu1 %v701_v17, %s617_s13 }
  0x26   : > { %160 = vrot.lane.b32.xlu0 %v704_v18, %s617_s13  ;;  %163 = vrot.lane.b32.xlu1 %v717_v22, %s617_s13 }
  0x84   : > { %v131_v24 = vpop.permute.xlu0 %130  ;;  %v137_v25 = vpop.permute.xlu1 %136 }
  0x85   : > { %v132_v26 = vsel %vm129_vm1, %v131_v24, %v643_v0  ;;  %v138_v27 = vsel %vm129_vm1, %v137_v25, %v646_v1  ;;  %v275_v24 = vrot.slane %v665_v7, 7  ;;  %v284_v25 = vrot.slane %v683_v12, 7 }
  0x86   : > { %166 = vrot.lane.b32.xlu0 %v132_v26, %s617_s13  ;;  %v298_v26 = vsel %vm288_vm2, %v283_v21, %v274_v23 }
  0x88   : > { %v134_v28 = vpop.permute.xlu0 %133  ;;  %v140_v29 = vpop.permute.xlu1 %139 }
  0x89   : > { %v135_v30 = vsel %vm129_vm1, %v134_v28, %v649_v2  ;;  %v141_v31 = vsel %vm129_vm1, %v140_v29, %v662_v6  ;;  %v280_v28 = vrot.slane %v646_v1, 7 }
  0x8a   : > { %170 = vrot.lane.b32.xlu0 %v138_v27, %s617_s13  ;;  %168 = vrot.lane.b32.xlu1 %v135_v30, %s617_s13  ;;  %v277_v27 = vrot.slane %v649_v2, 7  ;;  %v301_v30 = vsub.f32 %v643_v0, %v298_v26 }
  0x8c   : > { %v143_v32 = vpop.permute.xlu0 %142  ;;  %v146_v33 = vpop.permute.xlu1 %145 }
  0x8d   : > { %v144_v34 = vsel %vm129_vm1, %v143_v32, %v665_v7  ;;  %v147_v35 = vsel %vm129_vm1, %v146_v33, %v677_v10  ;;  %v278_v32 = vrot.slane %v677_v10, 7  ;;  %v276_v33 = vrot.slane %v698_v16, 7 }
  0x8e   : > { %172 = vrot.lane.b32.xlu1 %v141_v31, %s617_s13  ;;  %174 = vrot.lane.b32.xlu0 %v144_v34, %s617_s13  ;;  %v299_v31 = vsel %vm288_vm2, %v284_v25, %v275_v24  ;;  %v285_v34 = vrot.slane %v717_v22, 7 }
  0x90   : > { %v149_v36 = vpop.permute.xlu0 %148  ;;  %v152_v37 = vpop.permute.xlu1 %151 }
  0x91   : > { %v150_v38 = vsel %vm129_vm1, %v149_v36, %v680_v11  ;;  %v153_v39 = vsel %vm129_vm1, %v152_v37, %v683_v12  ;;  %v295_v36 = vsel %vm288_vm2, %v274_v23, %v277_v27  ;;  %v292_v37 = vsel %vm288_vm2, %v277_v27, %v280_v28 }
  0x92   : > { %176 = vrot.lane.b32.xlu1 %v147_v35, %s617_s13  ;;  %178 = vrot.lane.b32.xlu0 %v150_v38, %s617_s13  ;;  %v844_v35 = vand.u32 127, %v286_v19  ;;  %v289_v38 = vsel %vm288_vm2, %v280_v28, %v283_v21 }
  0x94   : > { %v155_v40 = vpop.permute.xlu0 %154  ;;  %v158_v41 = vpop.permute.xlu1 %157  ;;  %vm330_vm4 = vcmp.gt.s32.totalorder %v844_v35, 0 }
  0x95   : > { %v156_v42 = vsel %vm129_vm1, %v155_v40, %v698_v16  ;;  %v159_v43 = vsel %vm129_vm1, %v158_v41, %v701_v17  ;;  %v281_v40 = vrot.slane %v680_v11, 7  ;;  %v313_v41 = vand.u32 2147483647, %v301_v30 }
  0x96   : > { %180 = vrot.lane.b32.xlu1 %v153_v39, %s617_s13  ;;  %182 = vrot.lane.b32.xlu0 %v156_v42, %s617_s13  ;;  %v305_v39 = vsub.f32 %v665_v7, %v299_v31 }
  0x98   : > { %v161_v44 = vpop.permute.xlu0 %160  ;;  %v164_v45 = vpop.permute.xlu1 %163 }
  0x99   : > { %v162_v46 = vsel %vm129_vm1, %v161_v44, %v704_v18  ;;  %v165_v47 = vsel %vm129_vm1, %v164_v45, %v717_v22  ;;  %v302_v44 = vsub.f32 %v649_v2, %v295_v36  ;;  %v296_v45 = vsel %vm288_vm2, %v275_v24, %v278_v32 }
  0x9a   : > { %184 = vrot.lane.b32.xlu1 %v159_v43, %s617_s13  ;;  %186 = vrot.lane.b32.xlu0 %v162_v46, %s617_s13  ;;  %v300_v46 = vsel %vm288_vm2, %v285_v34, %v276_v33 }
  0x9e   : > { %188 = vrot.lane.b32.xlu1 %v165_v47, %s617_s13 }
  0xf8   : > { %v167_v48 = vpop.permute.xlu0 %166 }
  0xf9   : > { %v190_v49 = vsel %vm129_vm1, %v167_v48, %v643_v0  ;;  %v303_v48 = vsub.f32 %v646_v1, %v292_v37 }
  0xfa   : > { %214 = vrot.lane.b32.xlu0 %v190_v49, %s618_s17  ;;  %v304_v49 = vsub.f32 %v662_v6, %v289_v38 }
  0xfc   : > { %v169_v50 = vpop.permute.xlu1 %168  ;;  %v171_v51 = vpop.permute.xlu0 %170 }
  0xfd   : > { %v191_v52 = vsel %vm129_vm1, %v169_v50, %v649_v2  ;;  %v192_v53 = vsel %vm129_vm1, %v171_v51, %v646_v1  ;;  %v317_v50 = vand.u32 2147483647, %v305_v39  ;;  %v293_v51 = vsel %vm288_vm2, %v278_v32, %v281_v40 }
  0xfe   : > { %216 = vrot.lane.b32.xlu1 %v191_v52, %s618_s17  ;;  %218 = vrot.lane.b32.xlu0 %v192_v53, %s618_s17  ;;  %v279_v52 = vrot.slane %v701_v17, 7  ;;  %v357_v53 = vsel %vm345_vm3, %v313_v41, 0.0 }
 0x100   : > { %v173_v54 = vpop.permute.xlu1 %172  ;;  %v175_v55 = vpop.permute.xlu0 %174 }
 0x101   : > { %v193_v56 = vsel %vm129_vm1, %v173_v54, %v662_v6  ;;  %v194_v57 = vsel %vm129_vm1, %v175_v55, %v665_v7 }
 0x102   : > { %220 = vrot.lane.b32.xlu1 %v193_v56, %s618_s17  ;;  %222 = vrot.lane.b32.xlu0 %v194_v57, %s618_s17  ;;  %v309_v57 = vsub.f32 %v698_v16, %v300_v46 }
 0x104   : > { %v177_v58 = vpop.permute.xlu1 %176  ;;  %v179_v59 = vpop.permute.xlu0 %178  ;;  %v321_v21 = vand.u32 2147483647, %v309_v57 }
 0x105   : > { %v195_v60 = vsel %vm129_vm1, %v177_v58, %v677_v10  ;;  %v196_v61 = vsel %vm129_vm1, %v179_v59, %v680_v11  ;;  %v314_v58 = vand.u32 2147483647, %v302_v44 }
 0x106   : > { %224 = vrot.lane.b32.xlu1 %v195_v60, %s618_s17  ;;  %226 = vrot.lane.b32.xlu0 %v196_v61, %s618_s17  ;;  %v290_v60 = vsel %vm288_vm2, %v281_v40, %v284_v25  ;;  %v282_v61 = vrot.slane %v704_v18, 7 }
 0x107   : > { %v308_v19 = vsub.f32 %v683_v12, %v290_v60 }
 0x108   : > { %v181_v62 = vpop.permute.xlu1 %180  ;;  %v183_v63 = vpop.permute.xlu0 %182  ;;  %v291_v25 = vsel %vm288_vm2, %v282_v61, %v285_v34 }
 0x109   : > { %v197_v3 = vsel %vm129_vm1, %v181_v62, %v683_v12  ;;  %v198_v4 = vsel %vm129_vm1, %v183_v63, %v698_v16  ;;  %v315_v63 = vand.u32 2147483647, %v303_v48  ;;  %v312_v38 = vsub.f32 %v717_v22, %v291_v25 }
 0x10a   : > { %228 = vrot.lane.b32.xlu1 %v197_v3, %s618_s17  ;;  %230 = vrot.lane.b32.xlu0 %v198_v4, %s618_s17  ;;  %v876_v3 = vand.u32 2147483647, %v304_v49 }
 0x10b   : > { %v324_v20 = vand.u32 2147483647, %v312_v38 }
 0x10c   : > { %v185_v5 = vpop.permute.xlu1 %184  ;;  %v187_v8 = vpop.permute.xlu0 %186 }
 0x10d   : > { %v199_v9 = vsel %vm129_vm1, %v185_v5, %v701_v17  ;;  %v200_v13 = vsel %vm129_vm1, %v187_v8, %v704_v18  ;;  %v361_v5 = vsel %vm345_vm3, %v317_v50, 0.0 }
 0x10e   : > { %232 = vrot.lane.b32.xlu1 %v199_v9, %s618_s17  ;;  %234 = vrot.lane.b32.xlu0 %v200_v13, %s618_s17 }
 0x110   : > { %v189_v14 = vpop.permute.xlu1 %188 }
 0x111   : > { %v201_v15 = vsel %vm129_vm1, %v189_v14, %v717_v22 }
 0x112   : > { %236 = vrot.lane.b32.xlu1 %v201_v15, %s618_s17 }
 0x16c   : > { %v215_v29 = vpop.permute.xlu0 %214 }
 0x16d   : > { %v250_v47 = vsub.f32 %v643_v0, %v215_v29  ;;  %v306_v0 = vsub.f32 %v677_v10, %v296_v45 }
 0x16f   : > { %v262_v62 = vand.u32 2147483647, %v250_v47  ;;  %v318_v13 = vand.u32 2147483647, %v306_v0 }
 0x170   : > { %v217_v42 = vpop.permute.xlu1 %216  ;;  %v219_v43 = vpop.permute.xlu0 %218 }
 0x171   : > { %v251_v54 = vsub.f32 %v649_v2, %v217_v42  ;;  %v307_v2 = vsub.f32 %v680_v11, %v293_v51  ;;  %v252_v4 = vsub.f32 %v646_v1, %v219_v43  ;;  %v294_v1 = vsel %vm288_vm2, %v279_v52, %v282_v61 }
 0x172   : > { %v333_v26 = vsel %vm330_vm4, %v262_v62, 0.0  ;;  %v311_v37 = vsub.f32 %v704_v18, %v294_v1 }
 0x173   : > { %v263_v9 = vand.u32 2147483647, %v251_v54  ;;  %v319_v28 = vand.u32 2147483647, %v307_v2  ;;  %v264_v30 = vand.u32 2147483647, %v252_v4  ;;  %v369_v42 = vadd.f32 %v357_v53, %v333_v26 }
 0x174   : > { %v221_v55 = vpop.permute.xlu1 %220  ;;  %v223_v56 = vpop.permute.xlu0 %222 }
 0x175   : > { %v254_v59 = vsub.f32 %v665_v7, %v223_v56  ;;  %v297_v7 = vsel %vm288_vm2, %v276_v33, %v279_v52  ;;  %v334_v32 = vsel %vm330_vm4, %v263_v9, 0.0  ;;  %v320_v33 = vand.u32 2147483647, %v308_v19 }
 0x176   : > { %v310_v29 = vsub.f32 %v701_v17, %v297_v7  ;;  %v370_v46 = vadd.f32 %v334_v32, %v314_v58  ;;  %v335_v47 = vsel %vm330_vm4, %v264_v30, 0.0  ;;  %v382_v0 = vsel %vm381_vm5, %v369_v42, 0.0 }
 0x177   : > { %v266_v8 = vand.u32 2147483647, %v254_v59  ;;  %v371_v57 = vadd.f32 %v335_v47, %v315_v63 }
 0x178   : > { %v225_v14 = vpop.permute.xlu1 %224  ;;  %v227_v15 = vpop.permute.xlu0 %226  ;;  %v322_v45 = vand.u32 2147483647, %v310_v29  ;;  %v387_v60 = vsel %vm381_vm5, %v370_v46, 0.0 }
 0x179   : > { %v255_v23 = vsub.f32 %v677_v10, %v225_v14  ;;  %v256_v24 = vsub.f32 %v680_v11, %v227_v15  ;;  %v337_v27 = vsel %vm330_vm4, %v266_v8, 0.0  ;;  %v253_v10 = vsub.f32 %v662_v6, %v221_v55 }
 0x17a   : > { %v373_v39 = vadd.f32 %v361_v5, %v337_v27  ;;  %v365_v6 = vsel %vm345_vm3, %v321_v21, 0.0 }
 0x17b   : > { %v267_v31 = vand.u32 2147483647, %v255_v23  ;;  %v268_v11 = vand.u32 2147483647, %v256_v24  ;;  %v265_v48 = vand.u32 2147483647, %v253_v10 }
 0x17c   : > { %v229_v36 = vpop.permute.xlu1 %228  ;;  %v231_v34 = vpop.permute.xlu0 %230  ;;  %v383_v53 = vsel %vm381_vm5, %v373_v39, 0.0  ;;  %v392_v23 = vsel %vm381_vm5, %v371_v57, 0.0 }
 0x17d   : > { %v338_v40 = vsel %vm330_vm4, %v267_v31, 0.0  ;;  %v257_v41 = vsub.f32 %v683_v12, %v229_v36  ;;  %v339_v43 = vsel %vm330_vm4, %v268_v11, 0.0  ;;  %v258_v44 = vsub.f32 %v698_v16, %v231_v34 }
 0x17e   : > { %v374_v50 = vadd.f32 %v338_v40, %v318_v13  ;;  %v323_v12 = vand.u32 2147483647, %v311_v37  ;;  %v375_v55 = vadd.f32 %v339_v43, %v319_v28  ;;  %v336_v61 = vsel %vm330_vm4, %v265_v48, 0.0 }
 0x17f   : > { %v269_v49 = vand.u32 2147483647, %v257_v41  ;;  %v270_v51 = vand.u32 2147483647, %v258_v44  ;;  %v384_v4 = vadd.f32 %v383_v53, %v382_v0  ;;  %v372_v14 = vadd.f32 %v336_v61, %v876_v3 }
 0x180   : > { %v233_v52 = vpop.permute.xlu1 %232  ;;  %v235_v54 = vpop.permute.xlu0 %234  ;;  %v388_v5 = vsel %vm381_vm5, %v374_v50, 0.0  ;;  %v393_v63 = vsel %vm381_vm5, %v375_v55, 0.0 }
 0x181   : > { %v340_v56 = vsel %vm330_vm4, %v269_v49, 0.0  ;;  %v259_v16 = vsub.f32 %v701_v17, %v233_v52  ;;  %v341_v58 = vsel %vm330_vm4, %v270_v51, 0.0  ;;  %v260_v59 = vsub.f32 %v704_v18, %v235_v54 }
 0x182   : > { %v377_v62 = vadd.f32 %v365_v6, %v341_v58  ;;  %v376_v8 = vadd.f32 %v340_v56, %v320_v33  ;;  %v389_v24 = vadd.f32 %v388_v5, %v387_v60  ;;  %v394_v26 = vadd.f32 %v393_v63, %v392_v23 }
 0x183   : > { %v271_v2 = vand.u32 2147483647, %v259_v16  ;;  %v272_v17 = vand.u32 2147483647, %v260_v59  ;;  %v397_v30 = vsel %vm381_vm5, %v372_v14, 0.0 }
 0x184   : > { %v237_v7 = vpop.permute.xlu1 %236  ;;  %v385_v9 = vsel %vm381_vm5, %v377_v62, 0.0  ;;  %v398_v27 = vsel %vm381_vm5, %v376_v8, 0.0 }
 0x185   : > { %v342_v18 = vsel %vm330_vm4, %v271_v2, 0.0  ;;  %v261_v13 = vsub.f32 %v717_v22, %v237_v7  ;;  %v386_v15 = vadd.f32 %v385_v9, %v384_v4  ;;  %v343_v21 = vsel %vm330_vm4, %v272_v17, 0.0 }
 0x186   : > { %v378_v19 = vadd.f32 %v342_v18, %v322_v45  ;;  %v379_v1 = vadd.f32 %v343_v21, %v323_v12  ;;  %v399_v11 = vadd.f32 %v398_v27, %v397_v30 }
 0x187   : > { %v273_v25 = vand.u32 2147483647, %v261_v13  ;;  %601 = vtanh.f32 %v386_v15 }
 0x188   : > { %v390_v28 = vsel %vm381_vm5, %v378_v19, 0.0  ;;  %v395_v3 = vsel %vm381_vm5, %v379_v1, 0.0 }
 0x189   : > { %v391_v22 = vadd.f32 %v390_v28, %v389_v24  ;;  %v344_v29 = vsel %vm330_vm4, %v273_v25, 0.0  ;;  %v396_v10 = vadd.f32 %v395_v3, %v394_v26 }
 0x18a   : > { %v380_v31 = vadd.f32 %v344_v29, %v324_v20 }
 0x18b   : > { %603 = vtanh.f32 %v391_v22 }
 0x18c   : > { %605 = vtanh.f32 %v396_v10  ;;  %v400_v32 = vsel %vm381_vm5, %v380_v31, 0.0 }
 0x18d   : > { %v401_v33 = vadd.f32 %v400_v32, %v399_v11 }
 0x18f   : > { %607 = vtanh.f32 %v401_v33 }
 0x191   : > { %v602_v36 = vpop.eup %601 }
 0x192   : > { %v586_v34 = vpack.c.bf16 %v602_v36, %v602_v36 }
 0x194   : > { %567 = vst.msk [vmem:[%s670_s16 + $0x30] sm:$0xf] %vm450_vm0, %v586_v34 }
 0x195   : > { %v604_v37 = vpop.eup %603 }
 0x196   : > { %v606_v35 = vpop.eup %605  ;;  %v587_v38 = vpack.c.bf16 %v604_v37, %v604_v37 }
 0x197   : > { %v588_v39 = vpack.c.bf16 %v606_v35, %v606_v35 }
 0x198   : > { %568 = vst.msk [vmem:[%s670_s16 + $0x34] sm:$0xf] %vm450_vm0, %v587_v38 }
 0x199   : > { %v608_v40 = vpop.eup %607  ;;  %569 = vst.msk [vmem:[%s670_s16 + $0x38] sm:$0xf] %vm450_vm0, %v588_v39 }
 0x19a   : > { %v589_v41 = vpack.c.bf16 %v608_v40, %v608_v40 }
 0x19c   : > { %570 = vst.msk [vmem:[%s670_s16 + $0x3c] sm:$0xf] %vm450_vm0, %v589_v41 }
 0x19d PF: > { %s11_s6 = sadd.s32 1, %s615_s6  }
 0x19e   : > { %p8_p4 = scmp.ge.s32.totalorder %s11_s6, 4  }
 0x1a0   :  { %10 = sbr.rel (!%p8_p4) target bundleno = 1 (0x1), region = 55 }

// kernel: run.12
= control target key start
LH: loop header
LB: loop body
LE: loop exit
PB: predicated region body
PF: predicated region fallthrough
CT: control target
= control target key end

     0   :  { %9 = vsyncpa [#allocation3], 0  ;;  %s1043_s0 = inlined_call_operand.vmem [shape: bf16[2,4,1024], index: 0, kind: input, shape index: {}]   ;;  %s1044_s1 = inlined_call_operand.vmem [shape: bf16[2,4,1024], index: 1, kind: input, shape index: {}]   ;;  %s1045_s2 = inlined_call_operand.hbm [shape: bf16[2,1,1024], index: 2, kind: output, shape index: {0}]   ;;  %s1046_s3 = inlined_call_operand.vmem [shape: bf16[2,5,1024], index: 3, kind: output, shape index: {1}]  }
   0x1   :  { %11 = vsyncpa [#allocation3 + $0x1], 0  ;;  %s826_s12 = smov 0   ;;  %s828_s13 = smov 0  }
   0x2   :  { %s830_s14 = smov 0   ;;  %s832_s15 = smov 0  }
   0x3   :  { %s834_s16 = smov 0   ;;  %s836_s17 = smov 0  }
   0x4   :  { %s838_s18 = smov 0   ;;  %s840_s19 = smov 0  }
   0x5 LB: > { %s597_s20 = sadd.s32 4294967295, %s802_s19   ;;  %s598_s21 = sadd.s32 4294967294, %s802_s19   ;;  %s802_s19 = sphi %s840_s19, %s17_s19   ;;  %s798_s18 = sphi %s838_s18, %s1067_s18   ;;  %s794_s17 = sphi %s836_s17, %s1066_s17   ;;  %s790_s16 = sphi %s834_s16, %s1065_s16   ;;  %s786_s15 = sphi %s832_s15, %s1064_s15   ;;  %s782_s14 = sphi %s830_s14, %s1063_s14   ;;  %s778_s13 = sphi %s828_s13, %s1062_s13   ;;  %s774_s12 = sphi %s826_s12, %s1061_s12  }
   0x6   : > { %s26_s22 = sadd.s32 1, %s794_s17  ;;  %s29_s23 = sadd.s32 1, %s798_s18 }
   0x7   : > { %p27_p0 = scmp.ge.s32.totalorder %s26_s22, 2  ;;  %p104_p1 = scmp.ne.s32.totalorder %s782_s14, %s778_s13 }
   0x8   : > { %p105_p2 = scmp.eq.s32.totalorder %s597_s20, 3  ;;  %p110_p5 = scmp.ne.s32.totalorder %s778_s13, %s774_s12 }
   0x9   : > { %s1069_s22 = smov (%p27_p0, %s26_s22), 0  ;;  %s1071_s23 = smov (!%p27_p0, %s29_s23), %s798_s18 }
   0xa   : > { %s90_s24 = ssub.s32 %s794_s17, %s1069_s22  ;;  %p877_p3 = por %p105_p2, %p104_p1 }
   0xb   : > { %p31_p4 = scmp.ge.s32.totalorder %s1071_s23, 2  ;;  %p111_p6 = scmp.eq.s32.totalorder %s598_s21, 3 }
   0xc   : > { %p601_p7 = scmp.ge.s32.totalorder %s802_s19, 1  ;;  %p183_p9 = scmp.lt.s32.totalorder %s802_s19, 5 }
   0xd   : > { %s1073_s23 = smov (%p31_p4, %s1071_s23), 0  ;;  %p886_p8 = por %p111_p6, %p110_p5 }
   0xe   : > { %s89_s27 = ssub.s32 %s798_s18, %s1073_s23  ;;  %s94_s28 = sadd.s32 1, %s782_s14 }
   0xf   : > { %s91_s29 = sor.u32 %s90_s24, %s89_s27  ;;  %p184_p10 = pnand %p601_p7, %p183_p9 }
  0x10   : > { %p92_p11 = scmp.eq.s32.totalorder %s91_s29, 0  ;;  %s898_s4 = sshll.u32 (!%p184_p10), %s786_s15, 2  ;;  %vm276_vm0 = vcmask (!%p184_p10), 1043456   ;;  %v804_v30 = vmov (!%p184_p10), 1966171168   ;;  %v335_v32 = vlaneseq (!%p184_p10)  ;;  %vm355_vm1 = vcmask (!%p184_p10), 1040384  }
  0x11   : > { %187 = sbr.rel (%p184_p10) target bundleno = 92 (0x5c), region = 28  ;;  %p230_p12 = scmp.lt.s32.totalorder (!%p184_p10), %s790_s16, 1  ;;  %v333_v31 = vunpack.c.l.s4 (!%p184_p10), %v804_v30  ;;  %vm356_vm2 = vsmask.f32 (!%p184_p10), 256  ;;  %vm358_vm3 = vcmask (!%p184_p10), 1041409   ;;  %vm362_vm7 = vcmask (!%p184_p10), 1042434  }
  0x12   : > { %s895_s30 = scalar_select %p92_p11, %s782_s14, %s94_s28  }
  0x13   : > { %p232_p13 = scmp.lt.s32.totalorder (!%p184_p10), %s898_s4, 7  ;;  %vm359_vm4 = vsmask.f32 (!%p184_p10), 1280  ;;  %v334_v41 = vunpack.c.0.s8 (!%p184_p10), %v333_v31  ;;  %v336_v42 = vshrl.u32 (!%p184_p10), %v335_v32, 7  ;;  %vm921_vm5 = vmand (!%p184_p10), %vm355_vm1, %vm356_vm2  ;;  %s215_s27 = sand.u32 (!%p184_p10), 1, %s778_s13   ;;  %vm366_vm11 = vcmask (!%p184_p10), 1043459  }
  0x14   : > { %vm925_vm6 = vmand (!%p184_p10), %vm358_vm3, %vm359_vm4  ;;  %vm363_vm8 = vsmask.f32 (!%p184_p10), 2304  ;;  %s602_s28 = sshll.u32 (!%p184_p10), %s215_s27, 2  ;;  %s620_s29 = sshll.u32 (!%p184_p10), %s790_s16, 3  ;;  %vm367_vm12 = vsmask.f32 (!%p184_p10), 3328 }
  0x15   : > { %vm361_vm9 = vmor (!%p184_p10), %vm925_vm6, %vm921_vm5  ;;  %v337_v56 = vsub.s32 (!%p184_p10), %v334_v41, %v336_v42  ;;  %vm424_vm1 = vsmask.f32 (!%p184_p10), 6400 }
  0x16   : > { %vm936_vm10 = vmand (!%p184_p10), %vm362_vm7, %vm363_vm8 }
  0x17   : > { %vm948_vm13 = vmor (!%p184_p10), %vm936_vm10, %vm361_vm9 }
  0x18   : > { %s231_s5 = scalar_select %p230_p12, %s790_s16, 1  ;;  %vm953_vm14 = vmand %vm366_vm11, %vm367_vm12 }
  0x19   : > { %s233_s6 = scalar_select %p232_p13, %s898_s4, 7  ;;  %vm369_vm15 = vmor %vm953_vm14, %vm948_vm13 }
  0x1a   : > { %s604_s7 = sshll.u32 %s231_s5, 3  ;;  %s455_s16 = sadd.s32 %s620_s29, %s898_s4 }
  0x1b   : > { %s904_s8 = sadd.s32 %s604_s7, %s233_s6  ;;  %s621_s5 = sshll.u32 %s455_s16, 4 }
  0x1c   : > { %s605_s9 = sshll.u32 %s904_s8, 1  ;;  %s217_s6 = scalar_lea.vmem [#allocation2], %s602_s28 }
  0x1d   : > { %s237_s20 = scalar_lea.vmem %s1043_s0, %s605_s9  ;;  %s247_s15 = scalar_lea.vmem %s1044_s1, %s605_s9 }
  0x1e   : > { %v913_v0 = vld [vmem:[%s237_s20] sm:$0xff]  ;;  %s459_s7 = sshll.u32 %s217_s6, 4  ;;  %s611_s4 = sshll.u32 %s904_s8, 2  ;;  %s967_s7 = int_to_ptr.vmem [resolvable:$true] %s459_s7 }
  0x1f   : > { %v263_v1 = vld [vmem:[%s247_s15] sm:$0xff]  ;;  %v261_v2 = vunpack.c.l.bf16 %v913_v0  ;;  %v262_v3 = vunpack.c.h.bf16 %v913_v0  ;;  %s965_s11 = scalar_lea.hbm %s1045_s2, %s621_s5  ;;  %s972_s24 = scalar_lea.vmem %s1046_s3, %s611_s4 }
  0x20   : > { %v264_v4 = vunpack.c.l.bf16 %v263_v1  ;;  %v265_v5 = vunpack.c.h.bf16 %v263_v1  ;;  %s434_s8 = scalar_lea.sflag [#allocation3], %s215_s27  ;;  %s708_s15 = scalar_lea.vmem %s967_s7, 64 }
  0x21   : > { %p709_p0 = scmp.ne.s32.totalorder %s967_s7, %s708_s15  ;;  %s805_s28 = smov [#allocation2]  }
  0x22   : > { %v266_v6 = vsub.f32 %v261_v2, %v264_v4  ;;  %v267_v7 = vsub.f32 %v262_v3, %v265_v5  ;;  %s712_s29 = sshll.u32 %s805_s28, 4  ;;  %s713_s29 = int_to_ptr.vmem [resolvable:$false] %s712_s29 }
  0x23   : > { %p710_p1 = pnand %p709_p0, %p877_p3  ;;  %s714_s16 = scalar_lea.vmem %s713_s29, 128 }
  0x24   : > { %v268_v8 = vand.u32 2147483647, %v266_v6  ;;  %v269_v9 = vand.u32 2147483647, %v267_v7  ;;  %v370_v7 = vld [vmem:[%s217_s6] sm:$0xf]  ;;  %p715_p4 = scmp.lt.s32.totalorder %s967_s7, %s713_s29  ;;  %p716_p5 = scmp.lt.s32.totalorder %s714_s16, %s708_s15 }
  0x25   : > { %p711_p2 = pneg %p710_p1 }
  0x26   : > { %v272_v10 = vcombine.high %v268_v8, %v268_v8  ;;  %v273_v11 = vcombine.high %v269_v9, %v269_v9  ;;  %v277_v12 = vsel %vm276_vm0, %v268_v8, 0.0  ;;  %v291_v13 = vsel %vm276_vm0, %v269_v9, 0.0  ;;  %p717_p6 = por %p716_p5, %p715_p4 }
  0x27   : > { %v278_v14 = vrot.slane %v277_v12, 4  ;;  %v292_v15 = vrot.slane %v291_v13, 4 }
  0x28   : > { %v284_v16 = vsel %vm276_vm0, %v272_v10, 0.0  ;;  %v298_v17 = vsel %vm276_vm0, %v273_v11, 0.0  ;;  %vm423_vm0 = vcmask 1046534   ;;  %p718_p7 = pnand %p717_p6, %p711_p2 }
  0x29   : > { %v279_v18 = vadd.f32 %v278_v14, %v277_v12  ;;  %v285_v19 = vrot.slane %v284_v16, 4  ;;  %v293_v20 = vadd.f32 %v292_v15, %v291_v13  ;;  %v299_v21 = vrot.slane %v298_v17, 4  ;;  %vm974_vm2 = vmand %vm423_vm0, %vm424_vm1 }
  0x2b   : > { %v280_v22 = vrot.slane %v279_v18, 2  ;;  %v286_v23 = vadd.f32 %v285_v19, %v284_v16  ;;  %v294_v24 = vrot.slane %v293_v20, 2  ;;  %v300_v25 = vadd.f32 %v299_v21, %v298_v17 }
  0x2d   : > { %v281_v26 = vadd.f32 %v280_v22, %v279_v18  ;;  %v287_v27 = vrot.slane %v286_v23, 2  ;;  %v295_v28 = vadd.f32 %v294_v24, %v293_v20  ;;  %v301_v29 = vrot.slane %v300_v25, 2 }
  0x2f   : > { %v282_v33 = vrot.slane %v281_v26, 1  ;;  %v288_v34 = vadd.f32 %v287_v27, %v286_v23  ;;  %v296_v35 = vrot.slane %v295_v28, 1  ;;  %v302_v36 = vadd.f32 %v301_v29, %v300_v25 }
  0x31   : > { %v283_v37 = vadd.f32 %v282_v33, %v281_v26  ;;  %v289_v38 = vrot.slane %v288_v34, 1  ;;  %v297_v39 = vadd.f32 %v296_v35, %v295_v28  ;;  %v303_v40 = vrot.slane %v302_v36, 1 }
  0x33   : > { %v290_v44 = vadd.f32 %v289_v38, %v288_v34  ;;  %v304_v45 = vadd.f32 %v303_v40, %v302_v36  ;;  %v306_v46 = vmul.f32 0.25, %v283_v37  ;;  %v308_v47 = vmul.f32 0.25, %v297_v39 }
  0x35   : > { %v307_v49 = vmul.f32 0.25, %v290_v44  ;;  %v309_v50 = vmul.f32 0.25, %v304_v45  ;;  %v310_v51 = vmul.f32 -20.0, %v306_v46  ;;  %v312_v52 = vmul.f32 -20.0, %v308_v47 }
  0x37   : > { %v311_v53 = vmul.f32 -20.0, %v307_v49  ;;  %v313_v54 = vmul.f32 -20.0, %v309_v50  ;;  %v314_v55 = vmul.f32 1.442695, %v310_v51  ;;  %v318_v58 = vmul.f32 1.442695, %v312_v52 }
  0x39   : > { %v316_v59 = vmul.f32 1.442695, %v311_v53  ;;  %v320_v60 = vmul.f32 1.442695, %v313_v54  ;;  %v612_v61 = vpack.c.bf16 %v311_v53, %v310_v51  ;;  %v613_v62 = vpack.c.bf16 %v313_v54, %v312_v52 }
  0x3a   : > { %700 = vpow2.f32 %v314_v55 }
  0x3b   : > { %v338_v1 = vrot.slane %v612_v61, %v337_v56  ;;  %v345_v4 = vrot.slane %v613_v62, %v337_v56  ;;  %702 = vpow2.f32 %v316_v59 }
  0x3c   : > { %704 = vpow2.f32 %v318_v58 }
  0x3d   : > { %v346_v6 = vcombine.low %v338_v1, %v345_v4  ;;  %706 = vpow2.f32 %v320_v60 }
  0x3f   : > { %v353_v8 = vrot.slane %v346_v6, %v337_v56 }
  0x41   : > { %v371_v9 = vsel %vm369_vm15, %v353_v8, %v370_v7 }
  0x42   : > { %372 = vst [vmem:[%s217_s6] sm:$0xf] %v371_v9 }
  0x43   : > { %721 = shalt.err (!%p718_p7)
}
  0x44   : > { %s722_s27 = scalar_lea.hbm %s965_s11, 64  ;;  %s726_s4 = scalar_lea.hbm %s1045_s2, 256 }
  0x45   : > { %p723_p9 = scmp.ne.s32.totalorder %s965_s11, %s722_s27  ;;  %p727_p12 = scmp.lt.u32.totalorder %s965_s11, %s1045_s2 }
  0x46   : > { %p728_p13 = scmp.lt.u32.totalorder %s726_s4, %s722_s27  ;;  %p730_p1 = scmp.lt.u32.totalorder %s722_s27, %s965_s11 }
  0x47   : > { %p724_p10 = pnand %p723_p9, %p877_p3 }
  0x48   : > { %p729_p0 = por %p728_p13, %p727_p12 }
  0x49   : > { %p725_p11 = pneg %p724_p10 }
  0x4a   : > { %p731_p2 = por %p730_p1, %p729_p0 }
  0x4c   : > { %p732_p4 = pnand %p731_p2, %p725_p11 }
  0x4e   : > { %735 = shalt.err (!%p732_p4)
}
  0x4f   : > { %628 = dma.vmem_to_hbm [thread:$0]  (%p877_p3), %s967_s7, 64, %s965_s11, %s434_s8   ;;  %v701_v11 = vpop.eup %700  ;;  %vm426_vm3 = vmor %vm974_vm2, %vm936_vm10  ;;  %v427_v13 = vld [vmem:[%s972_s24] sm:$0x44]  ;;  %v430_v18 = vld [vmem:[%s972_s24 + $0x8] sm:$0x44] }
  0x50   : > { %v703_v12 = vpop.eup %702 }
  0x51   : > { %v705_v14 = vpop.eup %704  ;;  %v377_v15 = vcombine.low %v701_v11, %v703_v12  ;;  %v626_v16 = vpack.c.bf16 %v703_v12, %v701_v11 }
  0x52   : > { %v707_v17 = vpop.eup %706 }
  0x53   : > { %v381_v19 = vmul.f32 %v377_v15, %v261_v2  ;;  %v378_v20 = vcombine.low %v705_v14, %v707_v17  ;;  %v428_v21 = vsel %vm426_vm3, %v626_v16, %v427_v13  ;;  %v627_v22 = vpack.c.bf16 %v707_v17, %v705_v14 }
  0x54   : > { %429 = vst [vmem:[%s972_s24] sm:$0x44] %v428_v21 }
  0x55   : > { %v385_v23 = vcombine.high %v381_v19, %v381_v19  ;;  %v382_v24 = vmul.f32 %v378_v20, %v262_v3  ;;  %v431_v25 = vsel %vm426_vm3, %v627_v22, %v430_v18 }
  0x56   : > { %432 = vst [vmem:[%s972_s24 + $0x8] sm:$0x44] %v431_v25 }
  0x57   : > { %v624_v26 = vpack.c.bf16 %v385_v23, %v381_v19  ;;  %v386_v27 = vcombine.high %v382_v24, %v382_v24 }
  0x59   : > { %405 = vst [vmem:[%s972_s24] sm:$0x33] %v624_v26  ;;  %v625_v28 = vpack.c.bf16 %v386_v27, %v382_v24 }
  0x5b   : > { %406 = vst [vmem:[%s972_s24 + $0x8] sm:$0x33] %v625_v28 }
  0x5c PF: > { %p634_p3 = scmp.ge.s32.totalorder %s802_s19, 2  ;;  %s475_s25 = sand.u32 1, %s774_s12  }
  0x5d   : > { %s476_s7 = scalar_lea.sflag [#allocation3], %s475_s25 }
  0x5e   : > { %p631_p5 = pnand %p634_p3, %p886_p8 }
  0x60   : > { %769 = dma.done.wait (!%p631_p5), %s476_s7, 64  }
  0x61   : > { %771 = vsyncadd (!%p631_p5), %s476_s7, 4294967232  ;;  %s17_s19 = sadd.s32 1, %s802_s19   ;;  %s1061_s12 = smov %s778_s13 }
  0x62   : > { %p14_p6 = scmp.ge.s32.totalorder %s17_s19, 6   ;;  %s1062_s13 = smov %s782_s14 }
  0x63   : > { %s1063_s14 = smov %s895_s30  ;;  %s1064_s15 = smov %s794_s17 }
  0x64   : > { %s1065_s16 = smov %s798_s18  ;;  %s1066_s17 = smov %s1069_s22 }
  0x65   : > { %s1067_s18 = smov %s1073_s23  ;;  %16 = sbr.rel (!%p14_p6) target bundleno = 5 (0x5), region = 78 }
  0x6c   :  { %493 = vsyncpa [#allocation3], 1 }
  0x6d   :  { %495 = vsyncpa [#allocation3 + $0x1], 1 }

// kernel: run.15
= control target key start
LH: loop header
LB: loop body
LE: loop exit
PB: predicated region body
PF: predicated region fallthrough
CT: control target
= control target key end

     0   :  { %s416_s6 = smov 0   ;;  %s418_s7 = smov 0   ;;  %s471_s0 = inlined_call_operand.vmem [shape: f32[2,5,1024], index: 0, kind: input, shape index: {}]   ;;  %s472_s1 = inlined_call_operand.vmem [shape: bf16[2,4,1024], index: 1, kind: output, shape index: {}]  }
   0x1   :  { %s420_s8 = smov 0   ;;  %s422_s9 = smov 0  }
   0x2   :  { %s424_s10 = smov 0  }
   0x3 LB: > { %s20_s11 = sadd.s32 1, %s395_s8  ;;  %s23_s12 = sadd.s32 1, %s399_s9  ;;  %s403_s10 = sphi %s424_s10, %s11_s10   ;;  %s399_s9 = sphi %s422_s9, %s476_s9   ;;  %s395_s8 = sphi %s420_s8, %s475_s8   ;;  %s391_s7 = sphi %s418_s7, %s474_s7   ;;  %s387_s6 = sphi %s416_s6, %s473_s6  }
   0x4   : > { %p21_p0 = scmp.ge.s32.totalorder %s20_s11, 2  ;;  %p310_p1 = scmp.ge.s32.totalorder %s403_s10, 1 }
   0x5   : > { %p108_p2 = scmp.lt.s32.totalorder %s403_s10, 5 }
   0x6   : > { %s478_s11 = smov (%p21_p0, %s20_s11), 0  ;;  %s480_s12 = smov (!%p21_p0, %s23_s12), %s399_s9 }
   0x7   : > { %p109_p3 = pnand %p310_p1, %p108_p2  ;;  %p25_p4 = scmp.ge.s32.totalorder %s480_s12, 2 }
   0x8   : > { %s311_s13 = sshll.u32 (!%p109_p3), %s387_s6, 2  ;;  %p137_p5 = scmp.lt.s32.totalorder (!%p109_p3), %s391_s7, 1  ;;  %v165_v2 = vlaneseq (!%p109_p3)  ;;  %v405_v4 = vmov (!%p109_p3), 1983009808  }
   0x9   : > { %s482_s12 = smov (%p25_p4, %s480_s12), 0  ;;  %112 = sbr.rel (%p109_p3) target bundleno = 46 (0x2e), region = 24 }
   0xa   : > { %p139_p6 = scmp.lt.s32.totalorder (!%p109_p3), %s311_s13, 7  ;;  %v166_v3 = vshrl.u32 (!%p109_p3), %v165_v2, 7  ;;  %v200_v5 = vunpack.c.l.s4 (!%p109_p3), %v405_v4 }
   0xc   : > { %v167_v6 = vsub.s32 (!%p109_p3), 0, %v166_v3  ;;  %v171_v7 = vsub.s32 (!%p109_p3), 1, %v166_v3  ;;  %v175_v8 = vsub.s32 (!%p109_p3), 2, %v166_v3  ;;  %v179_v9 = vsub.s32 (!%p109_p3), 3, %v166_v3 }
   0xd   : > { %v201_v10 = vunpack.c.0.s8 (!%p109_p3), %v200_v5 }
   0xf   : > { %v204_v20 = vsub.s32 (!%p109_p3), %v201_v10, %v166_v3 }
  0x10   : > { %s484_s7 = smov (!%p137_p5, %s391_s7), 1  ;;  %s486_s13 = smov (!%p139_p6, %s311_s13), 7 }
  0x11   : > { %s312_s14 = sshll.u32 %s484_s7, 3 }
  0x12   : > { %s446_s15 = sadd.s32 %s312_s14, %s486_s13 }
  0x13   : > { %s313_s16 = sshll.u32 %s446_s15, 3  ;;  %s316_s20 = sshll.u32 %s446_s15, 1 }
  0x14   : > { %s144_s19 = scalar_lea.vmem %s471_s0, %s313_s16  ;;  %s154_s23 = scalar_lea.vmem %s472_s1, %s316_s20 }
  0x15   : > { %v317_v0 = vld [vmem:[%s144_s19 + $0x4] ss:$8 sm:$0xf]  ;;  %v156_v11 = vld [vmem:[%s144_s19] sm:$0xf] }
  0x16   : > { %v162_v1 = vadd.f32 1e-07, %v317_v0  ;;  %v157_v13 = vld [vmem:[%s144_s19 + $0x8] sm:$0xf]  ;;  %v158_v14 = vld [vmem:[%s144_s19 + $0x10] sm:$0xf] }
  0x17   : > { %v159_v15 = vld [vmem:[%s144_s19 + $0x18] sm:$0xf] }
  0x18   : > { %363 = vrcp.f32 %v162_v1 }
  0x22   : > { %v364_v12 = vpop.eup %363 }
  0x23   : > { %v168_v16 = vrot.slane %v364_v12, %v167_v6  ;;  %v172_v17 = vrot.slane %v364_v12, %v171_v7  ;;  %v176_v18 = vrot.slane %v364_v12, %v175_v8  ;;  %v180_v19 = vrot.slane %v364_v12, %v179_v9 }
  0x25   : > { %v185_v21 = vmul.f32 %v168_v16, %v156_v11  ;;  %v186_v22 = vmul.f32 %v172_v17, %v157_v13  ;;  %v187_v23 = vmul.f32 %v176_v18, %v158_v14  ;;  %v188_v24 = vmul.f32 %v180_v19, %v159_v15 }
  0x27   : > { %v318_v25 = vpack.c.bf16 %v186_v22, %v185_v21  ;;  %v319_v26 = vpack.c.bf16 %v188_v24, %v187_v23 }
  0x29   : > { %v205_v27 = vrot.slane %v318_v25, %v204_v20  ;;  %v212_v28 = vrot.slane %v319_v26, %v204_v20 }
  0x2b   : > { %v213_v29 = vcombine.low %v205_v27, %v212_v28 }
  0x2d   : > { %215 = vst [vmem:[%s154_s23] sm:$0xff] %v213_v29 }
  0x2e PF: > { %s11_s10 = sadd.s32 1, %s403_s10   ;;  %s473_s6 = smov %s395_s8 }
  0x2f   : > { %p8_p7 = scmp.ge.s32.totalorder %s11_s10, 6   ;;  %s474_s7 = smov %s399_s9 }
  0x30   : > { %s475_s8 = smov %s478_s11  ;;  %s476_s9 = smov %s482_s12 }
  0x31   :  { %10 = sbr.rel (!%p8_p7) target bundleno = 3 (0x3), region = 55 }

// kernel: run.16
= control target key start
LH: loop header
LB: loop body
LE: loop exit
PB: predicated region body
PF: predicated region fallthrough
CT: control target
= control target key end

     0   :  { %s861_s12 = smov 0   ;;  %s863_s13 = smov 0   ;;  %s997_s0 = inlined_call_operand.vmem [shape: bf16[2,43,1024], index: 0, kind: input, shape index: {}]   ;;  %s998_s1 = inlined_call_operand.vmem [shape: bf16[32,43], index: 1, kind: input, shape index: {}]   ;;  %s999_s2 = inlined_call_operand.vmem [shape: f32[32,1], index: 2, kind: input, shape index: {}]   ;;  %s1000_s3 = inlined_call_operand.vmem [shape: bf16[2,32,1024], index: 3, kind: output, shape index: {}]  }
   0x1   :  { %s865_s14 = smov 0   ;;  %s867_s15 = smov 0  }
   0x2   :  { %s869_s16 = smov 0   ;;  %s871_s17 = smov 0  }
   0x3   :  { %s873_s18 = smov 0  }
   0x4 LB: > { %s22_s19 = sadd.s32 1, %s829_s16  ;;  %s25_s20 = sadd.s32 1, %s833_s17  ;;  %s837_s18 = sphi %s873_s18, %s13_s18   ;;  %s833_s17 = sphi %s871_s17, %s1007_s17   ;;  %s829_s16 = sphi %s869_s16, %s1006_s16   ;;  %s825_s15 = sphi %s867_s15, %s1005_s15   ;;  %s821_s14 = sphi %s865_s14, %s1004_s14   ;;  %s817_s13 = sphi %s863_s13, %s1003_s13   ;;  %s813_s12 = sphi %s861_s12, %s1002_s12  }
   0x5   : > { %p23_p0 = scmp.ge.s32.totalorder %s22_s19, 2  ;;  %s652_s21 = sadd.s32 4294967295, %s837_s18  }
   0x6   : > { %p41_p1 = scmp.ne.s32.totalorder %s817_s13, %s813_s12  ;;  %p42_p2 = scmp.eq.s32.totalorder %s837_s18, 0 }
   0x7   : > { %s1009_s19 = smov (%p23_p0, %s22_s19), 0  ;;  %s1011_s20 = smov (!%p23_p0, %s25_s20), %s833_s17 }
   0x8   : > { %p27_p3 = scmp.ge.s32.totalorder %s1011_s20, 2  ;;  %p115_p4 = scmp.eq.s32.totalorder %s652_s21, 3 }
   0x9   : > { %s30_s22 = ssub.s32 %s829_s16, %s1009_s19  ;;  %p43_p5 = por %p42_p2, %p41_p1 }
   0xa   : > { %s1013_s20 = smov (%p27_p3, %s1011_s20), 0  ;;  %p909_p6 = por %p115_p4, %p41_p1 }
   0xb   : > { %s29_s24 = ssub.s32 %s833_s17, %s1013_s20  ;;  %s34_s26 = sadd.s32 1, %s817_s13 }
   0xc   : > { %s31_s25 = sor.u32 %s30_s22, %s29_s24  ;;  %p655_p8 = scmp.ge.s32.totalorder %s837_s18, 4 }
   0xd   : > { %p32_p7 = scmp.eq.s32.totalorder %s31_s25, 0 }
   0xe   : > { %143 = sbr.rel (%p655_p8) target bundleno = 35 (0x23), region = 24 }
   0xf   : > { %s917_s27 = scalar_select %p32_p7, %s817_s13, %s34_s26  }
  0x15   : > { %146 = sbr.rel (!%p43_p5) target bundleno = 35 (0x23), region = 28  ;;  %s148_s28 = sand.u32 (%p43_p5), 1, %s817_s13  }
  0x16   : > { %s700_s29 = smul.u32 (%p43_p5), 96, %s148_s28  ;;  %s656_s30 = sshll.u32 (%p43_p5), %s829_s16, 2 }
  0x17   : > { %s701_s4 = smul.u32 (%p43_p5), 48, %s833_s17 }
  0x18   : > { %s150_s10 = scalar_lea.vmem (%p43_p5), [#allocation2], %s700_s29 }
  0x19   : > { %s153_s5 = sadd.s32 (%p43_p5), %s701_s4, %s656_s30 }
  0x1a   : > { %s657_s6 = sshll.u32 (%p43_p5), %s153_s5, 2 }
  0x1b   : > { %s155_s9 = scalar_lea.vmem (%p43_p5), %s997_s0, %s657_s6 }
  0x1c   : > { %v168_v0 = vld [vmem:[%s155_s9] sm:$0xff]  ;;  %v170_v1 = vld [vmem:[%s155_s9 + $0x8] sm:$0xff] }
  0x1d   : > { %v172_v2 = vld [vmem:[%s155_s9 + $0x20] sm:$0xff]  ;;  %169 = vst [vmem:[%s150_s10] sm:$0xff] %v168_v0  ;;  %171 = vst [vmem:[%s150_s10 + $0x8] sm:$0xff] %v170_v1  ;;  %v174_v3 = vld [vmem:[%s155_s9 + $0x28] sm:$0xff] }
  0x1e   : > { %173 = vst [vmem:[%s150_s10 + $0x10] sm:$0xff] %v172_v2  ;;  %v176_v4 = vld [vmem:[%s155_s9 + $0x40] sm:$0xff]  ;;  %v178_v5 = vld [vmem:[%s155_s9 + $0x48] sm:$0xff]  ;;  %175 = vst [vmem:[%s150_s10 + $0x18] sm:$0xff] %v174_v3 }
  0x1f   : > { %177 = vst [vmem:[%s150_s10 + $0x20] sm:$0xff] %v176_v4  ;;  %179 = vst [vmem:[%s150_s10 + $0x28] sm:$0xff] %v178_v5  ;;  %v180_v6 = vld [vmem:[%s155_s9 + $0x60] sm:$0xff]  ;;  %v182_v7 = vld [vmem:[%s155_s9 + $0x68] sm:$0xff] }
  0x20   : > { %v184_v8 = vld [vmem:[%s155_s9 + $0x80] sm:$0xff]  ;;  %181 = vst [vmem:[%s150_s10 + $0x30] sm:$0xff] %v180_v6  ;;  %183 = vst [vmem:[%s150_s10 + $0x38] sm:$0xff] %v182_v7  ;;  %v186_v9 = vld [vmem:[%s155_s9 + $0x88] sm:$0xff] }
  0x21   : > { %185 = vst [vmem:[%s150_s10 + $0x40] sm:$0xff] %v184_v8  ;;  %v188_v10 = vld [vmem:[%s155_s9 + $0xa0] sm:$0xff]  ;;  %v190_v11 = vld [vmem:[%s155_s9 + $0xa8] sm:$0xff]  ;;  %187 = vst [vmem:[%s150_s10 + $0x48] sm:$0xff] %v186_v9 }
  0x22   : > { %189 = vst [vmem:[%s150_s10 + $0x50] sm:$0xff] %v188_v10  ;;  %191 = vst [vmem:[%s150_s10 + $0x58] sm:$0xff] %v190_v11 }
  0x23 PF: > { %p658_p9 = scmp.ge.s32.totalorder %s837_s18, 1  ;;  %p196_p10 = scmp.lt.s32.totalorder %s837_s18, 5 }
  0x25   : > { %p197_p11 = pnand %p658_p9, %p196_p10 }
  0x26   : > { %s203_s11 = sand.u32 (!%p197_p11), 1, %s813_s12   ;;  %v839_v12 = vmov (!%p197_p11), 0   ;;  %vm341_vm0 = vcmask (!%p197_p11), 1044480   ;;  %v244_v13 = vld [vmem:[%s999_s2] sm:$0xff] (!%p197_p11)  ;;  %v245_v15 = vld [vmem:[%s999_s2 + $0x8] sm:$0xff] (!%p197_p11)  ;;  %vm342_vm1 = vcmask (!%p197_p11), 1045504  }
  0x27   : > { %200 = sbr.rel (%p197_p11) target bundleno = 294 (0x126), region = 51  ;;  %389 = vmatprep.mubr.bf16.mxu0 (!%p197_p11), %v839_v12  ;;  %442 = vmatprep.mubr.bf16.mxu1 (!%p197_p11), %v839_v12  ;;  %v840_v19 = vmov (!%p197_p11), 65535   ;;  %v246_v31 = vld [vmem:[%s999_s2 + $0x10] sm:$0xff] (!%p197_p11)  ;;  %v247_v35 = vld [vmem:[%s999_s2 + $0x18] sm:$0xff] (!%p197_p11)  ;;  %v781_v36 = vld [vmem:[%s998_s1] sm:$0xff] (!%p197_p11)   ;;  %vm334_vm2 = vcmask (!%p197_p11), 351232  }
  0x28   : > { %s702_s21 = smul.u32 (!%p197_p11), 96, %s203_s11  ;;  %761 = vset.pattern.permute.xlu0 (!%p197_p11), %v839_v12  ;;  %762 = vset.pattern.permute.xlu1 (!%p197_p11), %v839_v12  ;;  %v343_v20 = vsel (!%p197_p11), %vm341_vm0, 4294967295, %v840_v19  ;;  %v782_v37 = vld [vmem:[%s998_s1 + $0x8] sm:$0xff] (!%p197_p11)   ;;  %s659_s10 = sshll.u32 (!%p197_p11), %s203_s11, 6 }
  0x29   : > { %250 = vperm.xlu0 (!%p197_p11), %761, %v244_v13   ;;  %v344_v25 = vsel (!%p197_p11), %vm342_vm1, %v343_v20, 0  ;;  %260 = vperm.xlu1 (!%p197_p11), %762, %v246_v31   ;;  %s951_s12 = scalar_lea.vmem (!%p197_p11), [#allocation3], %s659_s10 }
  0x2a   : > { %s205_s25 = scalar_lea.vmem (!%p197_p11), [#allocation2], %s702_s21 }
  0x2b   : > { %v763_v14 = vld [vmem:[%s205_s25 + $0x4] ss:$16 sps:$4 sm:$0xff] (!%p197_p11)   ;;  %v765_v16 = vld [vmem:[%s205_s25 + $0xc] ss:$16 sps:$4 sm:$0xff] (!%p197_p11)   ;;  %v767_v17 = vld [vmem:[%s205_s25] ss:$16 sps:$4 sm:$0xff] (!%p197_p11)  }
  0x2c   : > { %357 = vmatprep.subr.bf16.mxu0 (!%p197_p11), %v763_v14  ;;  %v768_v18 = vld [vmem:[%s205_s25 + $0x8] ss:$16 sps:$4 sm:$0xff] (!%p197_p11)   ;;  %410 = vmatprep.subr.bf16.mxu1 (!%p197_p11), %v765_v16  ;;  %v769_v21 = vld [vmem:[%s205_s25 + $0x24] ss:$16 sps:$4 sm:$0xff] (!%p197_p11)   ;;  %v771_v22 = vld [vmem:[%s205_s25 + $0x2c] ss:$16 sps:$4 sm:$0xff] (!%p197_p11)  }
  0x2d   : > { %358 = vmatpush1.bf16.msra.mxu0 (!%p197_p11), %v767_v17  ;;  %411 = vmatpush1.bf16.msra.mxu1 (!%p197_p11), %v768_v18  ;;  %v773_v23 = vld [vmem:[%s205_s25 + $0x20] ss:$16 sps:$4 sm:$0xff] (!%p197_p11)   ;;  %v774_v24 = vld [vmem:[%s205_s25 + $0x28] ss:$16 sps:$4 sm:$0xff] (!%p197_p11)  }
  0x2e   : > { %359 = vmatprep.subr.bf16.mxu0 %v769_v21  ;;  %255 = vperm.xlu0 %761, %v245_v15   ;;  %v775_v26 = vld [vmem:[%s205_s25 + $0x44] ss:$16 sps:$4 sm:$0x3f]   ;;  %v777_v27 = vld [vmem:[%s205_s25 + $0x4c] ss:$16 sps:$4 sm:$0x3f]  }
  0x2f   : > { %412 = vmatprep.subr.bf16.mxu1 %v771_v22  ;;  %v779_v28 = vld [vmem:[%s205_s25 + $0x40] ss:$16 sps:$4 sm:$0x3f]   ;;  %v349_v29 = vand.u32 %v775_v26, %v344_v25  ;;  %v780_v30 = vld [vmem:[%s205_s25 + $0x48] ss:$16 sps:$4 sm:$0x3f]   ;;  %v355_v32 = vand.u32 %v777_v27, %v344_v25  ;;  %265 = vperm.xlu1 %762, %v247_v35  }
  0x30   : > { %v346_v33 = vand.u32 %v779_v28, %v344_v25  ;;  %v352_v34 = vand.u32 %v780_v30, %v344_v25  ;;  %s687_s11 = sshll.u32 (%p909_p6), %s821_s14, 2  ;;  %s688_s21 = sshll.u32 (%p909_p6), %s825_s15, 5 }
  0x31   : > { %360 = vmatpush1.bf16.msra.mxu0 %v773_v23  ;;  %413 = vmatpush1.bf16.msra.mxu1 %v774_v24  ;;  %s544_s22 = sadd.s32 (%p909_p6), %s688_s21, %s687_s11 }
  0x32   : > { %361 = vmatprep.subr.bf16.mxu0 %v349_v29  ;;  %414 = vmatprep.subr.bf16.mxu1 %v355_v32  ;;  %s689_s23 = sshll.u32 (%p909_p6), %s544_s22, 2 }
  0x33   : > { %s546_s26 = scalar_lea.vmem (%p909_p6), %s1000_s3, %s689_s23 }
  0x35   : > { %362 = vmatpush1.bf16.msra.mxu0 %v346_v33  ;;  %415 = vmatpush1.bf16.msra.mxu1 %v352_v34 }
  0x38   : > { %674 = vmatmul.mubr.msk.bf16.vlgmr.msra.gmra.mrb[0].mxu0 %vm334_vm2, %v781_v36  ;;  %676 = vmatmul.mubr.msk.bf16.vlgmr.msra.gmra.mrb[0].mxu1 %vm334_vm2, %v781_v36 }
  0x39   : > { %399 = vmatprep.mubr.bf16.mxu0 %v839_v12  ;;  %452 = vmatprep.mubr.bf16.mxu1 %v839_v12 }
  0x40   : > { %675 = vmatmul.mubr.msk.bf16.gmra.mrb[4].mxu0 %vm334_vm2, %v782_v37  ;;  %677 = vmatmul.mubr.msk.bf16.gmra.mrb[4].mxu1 %vm334_vm2, %v782_v37 }
  0xa8   : > { %v251_v38 = vpop.permute.xlu0 %250  ;;  %v261_v40 = vpop.permute.xlu1 %260 }
  0xad   : > { %v256_v39 = vpop.permute.xlu0 %255 }
  0xae   : > { %v266_v3 = vpop.permute.xlu1 %265 }
 0x10b   : > { %v391_v41 = vpop.f32.mrb[0].mxu0  ;;  %v444_v42 = vpop.f32.mrb[0].mxu1 }
 0x10c   : > { %v392_v43 = vadd.f32 %v391_v41, %v251_v38  ;;  %v445_v44 = vadd.f32 %v444_v42, %v251_v38  ;;  %v393_v45 = vpop.f32.mrb[1].mxu0  ;;  %v446_v46 = vpop.f32.mrb[1].mxu1 }
 0x10d   : > { %v394_v47 = vadd.f32 %v393_v45, %v251_v38  ;;  %v447_v48 = vadd.f32 %v446_v46, %v251_v38  ;;  %v395_v49 = vpop.f32.mrb[2].mxu0  ;;  %v448_v50 = vpop.f32.mrb[2].mxu1 }
 0x10e   : > { %v463_v51 = vmax.f32 %v392_v43, 0.0  ;;  %v465_v52 = vmax.f32 %v445_v44, 0.0  ;;  %v396_v53 = vadd.f32 %v395_v49, %v256_v39  ;;  %v449_v54 = vadd.f32 %v448_v50, %v256_v39  ;;  %v397_v55 = vpop.f32.mrb[3].mxu0  ;;  %v450_v56 = vpop.f32.mrb[3].mxu1 }
 0x10f   : > { %v464_v57 = vmax.f32 %v394_v47, 0.0  ;;  %v466_v58 = vmax.f32 %v447_v48, 0.0  ;;  %v398_v59 = vadd.f32 %v397_v55, %v256_v39  ;;  %v451_v60 = vadd.f32 %v450_v56, %v256_v39 }
 0x110   : > { %v467_v61 = vmax.f32 %v396_v53, 0.0  ;;  %v469_v62 = vmax.f32 %v449_v54, 0.0 }
 0x111   : > { %v692_v63 = vpack.c.bf16 %v464_v57, %v463_v51  ;;  %v693_v0 = vpack.c.bf16 %v466_v58, %v465_v52  ;;  %v468_v1 = vmax.f32 %v398_v59, 0.0  ;;  %v470_v2 = vmax.f32 %v451_v60, 0.0 }
 0x113   : > { %527 = vst [vmem:[%s951_s12] sm:$0xff] %v692_v63  ;;  %528 = vst [vmem:[%s951_s12 + $0x8] sm:$0xff] %v693_v0  ;;  %v694_v4 = vpack.c.bf16 %v468_v1, %v467_v61  ;;  %v695_v5 = vpack.c.bf16 %v470_v2, %v469_v62  ;;  %v401_v6 = vpop.f32.mrb[4].mxu0  ;;  %v454_v7 = vpop.f32.mrb[4].mxu1 }
 0x114   : > { %v402_v8 = vadd.f32 %v401_v6, %v261_v40  ;;  %v455_v9 = vadd.f32 %v454_v7, %v261_v40  ;;  %v403_v10 = vpop.f32.mrb[5].mxu0  ;;  %v456_v11 = vpop.f32.mrb[5].mxu1 }
 0x115   : > { %529 = vst [vmem:[%s951_s12 + $0x10] sm:$0xff] %v694_v4  ;;  %530 = vst [vmem:[%s951_s12 + $0x18] sm:$0xff] %v695_v5  ;;  %v404_v12 = vadd.f32 %v403_v10, %v261_v40  ;;  %v457_v13 = vadd.f32 %v456_v11, %v261_v40  ;;  %v405_v14 = vpop.f32.mrb[6].mxu0  ;;  %v458_v15 = vpop.f32.mrb[6].mxu1 }
 0x116   : > { %v471_v16 = vmax.f32 %v402_v8, 0.0  ;;  %v473_v17 = vmax.f32 %v455_v9, 0.0  ;;  %v406_v18 = vadd.f32 %v405_v14, %v266_v3  ;;  %v459_v19 = vadd.f32 %v458_v15, %v266_v3  ;;  %v407_v20 = vpop.f32.mrb[7].mxu0  ;;  %v460_v21 = vpop.f32.mrb[7].mxu1 }
 0x117   : > { %v472_v22 = vmax.f32 %v404_v12, 0.0  ;;  %v474_v23 = vmax.f32 %v457_v13, 0.0  ;;  %v408_v24 = vadd.f32 %v407_v20, %v266_v3  ;;  %v461_v25 = vadd.f32 %v460_v21, %v266_v3  ;;  %541 = sbr.rel (!%p909_p6) target bundleno = 294 (0x126), region = 59 }
 0x118   : > { %v475_v26 = vmax.f32 %v406_v18, 0.0  ;;  %v477_v27 = vmax.f32 %v459_v19, 0.0 }
 0x119   : > { %v696_v28 = vpack.c.bf16 %v472_v22, %v471_v16  ;;  %v697_v29 = vpack.c.bf16 %v474_v23, %v473_v17  ;;  %v476_v30 = vmax.f32 %v408_v24, 0.0  ;;  %v478_v31 = vmax.f32 %v461_v25, 0.0 }
 0x11a   : > { %v559_v34 = vld [vmem:[%s951_s12] sm:$0xff] (%p909_p6)  ;;  %v561_v35 = vld [vmem:[%s951_s12 + $0x8] sm:$0xff] (%p909_p6) }
 0x11b   : > { %531 = vst [vmem:[%s951_s12 + $0x20] sm:$0xff] %v696_v28  ;;  %532 = vst [vmem:[%s951_s12 + $0x28] sm:$0xff] %v697_v29  ;;  %v698_v32 = vpack.c.bf16 %v476_v30, %v475_v26  ;;  %v699_v33 = vpack.c.bf16 %v478_v31, %v477_v27 }
 0x11c   : > { %v563_v36 = vld [vmem:[%s951_s12 + $0x10] sm:$0xff] (%p909_p6)  ;;  %v565_v37 = vld [vmem:[%s951_s12 + $0x18] sm:$0xff] (%p909_p6)  ;;  %560 = vst [vmem:[%s546_s26] sm:$0xff] (%p909_p6), %v559_v34  ;;  %562 = vst [vmem:[%s546_s26 + $0x8] sm:$0xff] (%p909_p6), %v561_v35 }
 0x11d   : > { %533 = vst [vmem:[%s951_s12 + $0x30] sm:$0xff] %v698_v32  ;;  %534 = vst [vmem:[%s951_s12 + $0x38] sm:$0xff] %v699_v33 }
 0x11e   : > { %564 = vst [vmem:[%s546_s26 + $0x20] sm:$0xff] %v563_v36  ;;  %566 = vst [vmem:[%s546_s26 + $0x28] sm:$0xff] %v565_v37 }
 0x122   : > { %v567_v38 = vld [vmem:[%s951_s12 + $0x20] sm:$0xff]  ;;  %v569_v39 = vld [vmem:[%s951_s12 + $0x28] sm:$0xff] }
 0x123   : > { %568 = vst [vmem:[%s546_s26 + $0x40] sm:$0xff] %v567_v38  ;;  %570 = vst [vmem:[%s546_s26 + $0x48] sm:$0xff] %v569_v39 }
 0x124   : > { %v571_v40 = vld [vmem:[%s951_s12 + $0x30] sm:$0xff]  ;;  %v573_v41 = vld [vmem:[%s951_s12 + $0x38] sm:$0xff] }
 0x125   : > { %572 = vst [vmem:[%s546_s26 + $0x60] sm:$0xff] %v571_v40  ;;  %574 = vst [vmem:[%s546_s26 + $0x68] sm:$0xff] %v573_v41 }
 0x126 PF: > { %s13_s18 = sadd.s32 1, %s837_s18   ;;  %s1002_s12 = smov %s817_s13 }
 0x127   : > { %p10_p12 = scmp.ge.s32.totalorder %s13_s18, 6   ;;  %s1003_s13 = smov %s917_s27 }
 0x128   : > { %s1004_s14 = smov %s829_s16  ;;  %s1005_s15 = smov %s833_s17 }
 0x129   : > { %s1006_s16 = smov %s1009_s19  ;;  %s1007_s17 = smov %s1013_s20 }
 0x12a   :  { %12 = sbr.rel (!%p10_p12) target bundleno = 4 (0x4), region = 113 }

// kernel: run.17
= control target key start
LH: loop header
LB: loop body
LE: loop exit
PB: predicated region body
PF: predicated region fallthrough
CT: control target
= control target key end

     0   :  { %s650_s12 = smov 0   ;;  %s652_s13 = smov 0   ;;  %s746_s0 = inlined_call_operand.vmem [shape: bf16[2,32,1024], index: 0, kind: input, shape index: {}]   ;;  %s747_s1 = inlined_call_operand.vmem [shape: bf16[3,32], index: 1, kind: input, shape index: {}]   ;;  %s748_s2 = inlined_call_operand.vmem [shape: f32[3,1], index: 2, kind: input, shape index: {}]   ;;  %s749_s3 = inlined_call_operand.vmem [shape: f32[2,3,1024], index: 3, kind: output, shape index: {}]  }
   0x1   :  { %s654_s14 = smov 0   ;;  %s656_s15 = smov 0  }
   0x2   :  { %s658_s16 = smov 0   ;;  %s660_s17 = smov 0  }
   0x3   :  { %s662_s18 = smov 0  }
   0x4 LB: > { %s22_s19 = sadd.s32 1, %s619_s16  ;;  %s25_s20 = sadd.s32 1, %s623_s17  ;;  %s627_s18 = sphi %s662_s18, %s13_s18   ;;  %s623_s17 = sphi %s660_s17, %s755_s17   ;;  %s619_s16 = sphi %s658_s16, %s754_s16   ;;  %s615_s15 = sphi %s656_s15, %s753_s15   ;;  %s611_s14 = sphi %s654_s14, %s752_s14   ;;  %s607_s13 = sphi %s652_s13, %s751_s13   ;;  %s603_s12 = sphi %s650_s12, %s750_s12  }
   0x5   : > { %p23_p0 = scmp.ge.s32.totalorder %s22_s19, 2  ;;  %p41_p1 = scmp.ne.s32.totalorder %s607_s13, %s603_s12 }
   0x6   : > { %p42_p2 = scmp.eq.s32.totalorder %s627_s18, 0  ;;  %s34_s24 = sadd.s32 1, %s607_s13 }
   0x7   : > { %s757_s19 = smov (%p23_p0, %s22_s19), 0  ;;  %s759_s20 = smov (!%p23_p0, %s25_s20), %s623_s17 }
   0x8   : > { %p43_p3 = por %p42_p2, %p41_p1  ;;  %p27_p4 = scmp.ge.s32.totalorder %s759_s20, 2 }
   0x9   : > { %s30_s21 = ssub.s32 %s619_s16, %s757_s19  ;;  %p481_p6 = scmp.ge.s32.totalorder %s627_s18, 4 }
   0xa   : > { %s761_s20 = smov (%p27_p4, %s759_s20), 0 }
   0xb   : > { %s29_s22 = ssub.s32 %s623_s17, %s761_s20  ;;  %143 = sbr.rel (%p481_p6) target bundleno = 29 (0x1d), region = 24 }
   0xc   : > { %s31_s23 = sor.u32 %s30_s21, %s29_s22 }
   0xd   : > { %p32_p5 = scmp.eq.s32.totalorder %s31_s23, 0 }
   0xf   : > { %s701_s25 = scalar_select %p32_p5, %s607_s13, %s34_s24  }
  0x12   : > { %146 = sbr.rel (!%p43_p3) target bundleno = 29 (0x1d), region = 28  ;;  %s148_s26 = sand.u32 (%p43_p3), 1, %s607_s13  }
  0x13   : > { %s483_s27 = sshll.u32 (%p43_p3), %s619_s16, 2  ;;  %s482_s28 = sshll.u32 (%p43_p3), %s148_s26, 6 }
  0x14   : > { %s484_s29 = sshll.u32 (%p43_p3), %s623_s17, 5  ;;  %s150_s8 = scalar_lea.vmem (%p43_p3), [#allocation2], %s482_s28 }
  0x15   : > { %s153_s30 = sadd.s32 (%p43_p3), %s484_s29, %s483_s27 }
  0x16   : > { %s485_s4 = sshll.u32 (%p43_p3), %s153_s30, 2 }
  0x17   : > { %s155_s7 = scalar_lea.vmem (%p43_p3), %s746_s0, %s485_s4 }
  0x18   : > { %v168_v0 = vld [vmem:[%s155_s7] sm:$0xff] (%p43_p3)  ;;  %v170_v1 = vld [vmem:[%s155_s7 + $0x8] sm:$0xff] (%p43_p3) }
  0x19   : > { %v172_v2 = vld [vmem:[%s155_s7 + $0x20] sm:$0xff]  ;;  %169 = vst [vmem:[%s150_s8] sm:$0xff] %v168_v0  ;;  %171 = vst [vmem:[%s150_s8 + $0x8] sm:$0xff] %v170_v1  ;;  %v174_v3 = vld [vmem:[%s155_s7 + $0x28] sm:$0xff] }
  0x1a   : > { %173 = vst [vmem:[%s150_s8 + $0x10] sm:$0xff] %v172_v2  ;;  %v176_v4 = vld [vmem:[%s155_s7 + $0x40] sm:$0xff]  ;;  %v178_v5 = vld [vmem:[%s155_s7 + $0x48] sm:$0xff]  ;;  %175 = vst [vmem:[%s150_s8 + $0x18] sm:$0xff] %v174_v3 }
  0x1b   : > { %177 = vst [vmem:[%s150_s8 + $0x20] sm:$0xff] %v176_v4  ;;  %179 = vst [vmem:[%s150_s8 + $0x28] sm:$0xff] %v178_v5  ;;  %v180_v6 = vld [vmem:[%s155_s7 + $0x60] sm:$0xff]  ;;  %v182_v7 = vld [vmem:[%s155_s7 + $0x68] sm:$0xff] }
  0x1c   : > { %181 = vst [vmem:[%s150_s8 + $0x30] sm:$0xff] %v180_v6  ;;  %183 = vst [vmem:[%s150_s8 + $0x38] sm:$0xff] %v182_v7 }
  0x1d PF: > { %p486_p7 = scmp.ge.s32.totalorder %s627_s18, 1  ;;  %p188_p8 = scmp.lt.s32.totalorder %s627_s18, 5 }
  0x1f   : > { %p189_p9 = pnand %p486_p7, %p188_p8 }
  0x20   : > { %s195_s9 = sand.u32 (!%p189_p9), 1, %s603_s12   ;;  %v629_v8 = vmov (!%p189_p9), 0   ;;  %v243_v9 = vld [vmem:[%s748_s2] sm:$0x7] (!%p189_p9)  ;;  %vm289_vm0 = vcmask (!%p189_p9), 261120   ;;  %s488_s24 = sshll.u32 (!%p189_p9), %s611_s14, 2 }
  0x21   : > { %192 = sbr.rel (%p189_p9) target bundleno = 262 (0x106), region = 51  ;;  %s487_s10 = sshll.u32 (!%p189_p9), %s195_s9, 6  ;;  %325 = vmatprep.mubr.bf16.mxu0 (!%p189_p9), %v629_v8  ;;  %366 = vmatprep.mubr.bf16.mxu1 (!%p189_p9), %v629_v8  ;;  %v234_v18 = vld [vmem:[%s747_s1] sm:$0x3] (!%p189_p9) }
  0x22   : > { %560 = vset.pattern.permute.xlu0 (!%p189_p9), %v629_v8  ;;  %s197_s22 = scalar_lea.vmem (!%p189_p9), [#allocation2], %s487_s10  ;;  %p224_p10 = scmp.lt.s32.totalorder (!%p189_p9), %s615_s15, 1 }
  0x23   : > { %v561_v10 = vld [vmem:[%s197_s22 + $0x4] ss:$16 sps:$4 sm:$0xff] (!%p189_p9)   ;;  %246 = vperm.xlu0 (!%p189_p9), %560, %v243_v9   ;;  %v563_v11 = vld [vmem:[%s197_s22 + $0xc] ss:$16 sps:$4 sm:$0xff] (!%p189_p9)   ;;  %v565_v12 = vld [vmem:[%s197_s22] ss:$16 sps:$4 sm:$0xff] (!%p189_p9)  }
  0x24   : > { %293 = vmatprep.subr.bf16.mxu0 (!%p189_p9), %v561_v10  ;;  %v566_v13 = vld [vmem:[%s197_s22 + $0x8] ss:$16 sps:$4 sm:$0xff] (!%p189_p9)   ;;  %334 = vmatprep.subr.bf16.mxu1 (!%p189_p9), %v563_v11  ;;  %v567_v14 = vld [vmem:[%s197_s22 + $0x24] ss:$16 sps:$4 sm:$0xff] (!%p189_p9)   ;;  %v569_v15 = vld [vmem:[%s197_s22 + $0x2c] ss:$16 sps:$4 sm:$0xff] (!%p189_p9)  }
  0x25   : > { %294 = vmatpush1.bf16.msra.mxu0 (!%p189_p9), %v565_v12  ;;  %335 = vmatpush1.bf16.msra.mxu1 (!%p189_p9), %v566_v13  ;;  %v571_v16 = vld [vmem:[%s197_s22 + $0x20] ss:$16 sps:$4 sm:$0xff] (!%p189_p9)   ;;  %v572_v17 = vld [vmem:[%s197_s22 + $0x28] ss:$16 sps:$4 sm:$0xff] (!%p189_p9)   ;;  %p226_p11 = scmp.lt.s32.totalorder (!%p189_p9), %s488_s24, 7 }
  0x26   : > { %295 = vmatprep.subr.bf16.mxu0 (!%p189_p9), %v567_v14  ;;  %336 = vmatprep.subr.bf16.mxu1 (!%p189_p9), %v569_v15 }
  0x28   : > { %s763_s15 = smov (!%p224_p10, %s615_s15), 1  ;;  %s765_s24 = smov (!%p226_p11, %s488_s24), 7 }
  0x29   : > { %296 = vmatpush1.bf16.msra.mxu0 %v571_v16  ;;  %337 = vmatpush1.bf16.msra.mxu1 %v572_v17  ;;  %s489_s26 = sshll.u32 %s763_s15, 3 }
  0x2a   : > { %s229_s27 = sadd.s32 %s489_s26, %s765_s24 }
  0x2b   : > { %s490_s28 = sshll.u32 %s229_s27, 2 }
  0x2c   : > { %499 = vmatmul.mubr.msk.bf16.vlgmr.msra.gmra.mrb[0].mxu0 %vm289_vm0, %v234_v18  ;;  %500 = vmatmul.mubr.msk.bf16.vlgmr.msra.gmra.mrb[0].mxu1 %vm289_vm0, %v234_v18  ;;  %s231_s30 = scalar_lea.vmem %s749_s3, %s490_s28 }
  0xa2   : > { %v247_v19 = vpop.permute.xlu0 %246 }
  0xff   : > { %v327_v20 = vpop.f32.mrb[0].mxu0  ;;  %v368_v21 = vpop.f32.mrb[0].mxu1 }
 0x100   : > { %v328_v22 = vadd.f32 %v327_v20, %v247_v19  ;;  %v369_v23 = vadd.f32 %v368_v21, %v247_v19  ;;  %v329_v24 = vpop.f32.mrb[1].mxu0  ;;  %v370_v25 = vpop.f32.mrb[1].mxu1 }
 0x101   : > { %v330_v26 = vadd.f32 %v329_v24, %v247_v19  ;;  %v371_v27 = vadd.f32 %v370_v25, %v247_v19  ;;  %v331_v28 = vpop.f32.mrb[2].mxu0  ;;  %v372_v29 = vpop.f32.mrb[2].mxu1 }
 0x102   : > { %v332_v30 = vpop.f32.mrb[3].mxu0  ;;  %v373_v31 = vpop.f32.mrb[3].mxu1 }
 0x103   : > { %v379_v32 = vcombine.low %v328_v22, %v330_v26  ;;  %v380_v33 = vcombine.low %v369_v23, %v371_v27 }
 0x105   : > { %383 = vst [vmem:[%s231_s30] sm:$0x77] %v379_v32  ;;  %384 = vst [vmem:[%s231_s30 + $0x8] sm:$0x77] %v380_v33 }
 0x106 PF: > { %s13_s18 = sadd.s32 1, %s627_s18   ;;  %s750_s12 = smov %s607_s13 }
 0x107   : > { %p10_p12 = scmp.ge.s32.totalorder %s13_s18, 6   ;;  %s751_s13 = smov %s701_s25 }
 0x108   : > { %s752_s14 = smov %s619_s16  ;;  %s753_s15 = smov %s623_s17 }
 0x109   : > { %s754_s16 = smov %s757_s19  ;;  %s755_s17 = smov %s761_s20 }
 0x10a   :  { %12 = sbr.rel (!%p10_p12) target bundleno = 4 (0x4), region = 90 }

</bundles_post_ra>
